<compile_context>
chip_gen: v5e
topology: v5e:2x2
jax: 0.10.0
libtpu: 0.0.40
codegen_flags: <defaults>
</compile_context>

<pallas_src>
import math
import jax
import jax.numpy as jnp
from jax.experimental import pallas as pl
from jax.experimental.pallas import tpu as pltpu


def _cnn_rnn_kernel(x_ref, wxg_ref, whh_ref, wl_ref, b_ref, out_ref, gi_ref):
    TBT, KC = x_ref.shape            # (T*TB, K*C) unfolded conv windows
    H2, G = whh_ref.shape            # GRU hidden (2H), G = 3*H2
    H4 = wl_ref.shape[1]             # Linear output (4H)
    TB = out_ref.shape[0]            # batch rows per grid step
    T = TBT // TB                    # 'valid' conv / GRU sequence length

    # Packed biases (f32): row 0 = fused input bias, 1 = b_hn, 2 = linear.
    b_xg = b_ref[0:1, :]             # (1, G)
    b_hn = b_ref[1:2, :H2]           # (1, H2)
    bl = b_ref[2:3, :H4]             # (1, H4)

    # ---- Fused Conv1d + GRU input projection: ONE matmul for all timesteps,
    #      staged t-major in VMEM scratch ----
    gi_ref[...] = jnp.dot(x_ref[...].astype(jnp.bfloat16), wxg_ref[...],
                          preferred_element_type=jnp.float32) + b_xg

    # ---- GRU recurrence (PyTorch gate order r, z, n), h0 = 0 ----
    whh = whh_ref[...]                                   # loaded once (bf16)
    bhn_b = jnp.broadcast_to(b_hn, (TB, H2))             # hoisted broadcast

    # t = 0 peeled: h == 0  =>  gh == 0 (r/z parts of b_hh already folded in).
    gi_t = gi_ref[pl.ds(0, TB), :]
    r = jax.nn.sigmoid(gi_t[:, 0 * H2:1 * H2])
    z = jax.nn.sigmoid(gi_t[:, 1 * H2:2 * H2])
    n = jnp.tanh(gi_t[:, 2 * H2:3 * H2] + r * bhn_b)
    h = (1.0 - z) * n

    for t in range(1, T):                                # small static T: unrolled
        gi_t = gi_ref[pl.ds(t * TB, TB), :]              # aligned (TB, G) load
        gh = jnp.dot(h.astype(jnp.bfloat16), whh,
                     preferred_element_type=jnp.float32)
        r = jax.nn.sigmoid(gi_t[:, 0 * H2:1 * H2] + gh[:, 0 * H2:1 * H2])
        z = jax.nn.sigmoid(gi_t[:, 1 * H2:2 * H2] + gh[:, 1 * H2:2 * H2])
        n = jnp.tanh(gi_t[:, 2 * H2:3 * H2] + r * (gh[:, 2 * H2:3 * H2] + bhn_b))
        h = (1.0 - z) * n + z * h

    # ---- Linear(2H -> 4H) on the final hidden state ----
    out_ref[...] = jnp.dot(h.astype(jnp.bfloat16), wl_ref[...],
                           preferred_element_type=jnp.float32) + bl


def _pick_tb(B):
    """Batch rows per grid step: largest multiple-of-8 tile <= 256 dividing B,
    keeping >= 2 grid steps when possible so v7x's two TCs both get work."""
    if B % 8 != 0:
        return B                      # tiny / odd batch: single block
    cap = min(B, 256)
    best = 8
    for tb in range(8, cap + 1, 8):
        if B % tb == 0:
            best = tb
    if best == B and B >= 16 and (B // 2) % 8 == 0:
        best = B // 2                 # keep grid length >= 2 (dual-TC on v7x)
    return best


def cnn_rnn_forward(x, params):
    B, L, C = x.shape
    KC, G = params["wxg"].shape
    K = KC // C
    T = L - (K - 1)
    H2 = params["whh"].shape[0]
    H4 = params["wl"].shape[1]

    TB = _pick_tb(B)
    assert B % TB == 0
    Bt = B // TB

    # Wrapper-side im2col + batch-tile blocking (pure layout plumbing):
    # x_blk[g, t*TB + j, k*C + c] = x[g*TB + j, t + k, c]
    x_t = jnp.transpose(x, (1, 0, 2))                                  # (L, B, C)
    x_unf = jnp.concatenate([x_t[k:k + T] for k in range(K)], axis=-1)  # (T, B, KC)
    x_blk = (x_unf.reshape(T, Bt, TB, KC)
                  .transpose(1, 0, 2, 3)
                  .reshape(Bt, T * TB, KC))                            # (Bt, T*TB, KC)

    return pl.pallas_call(
        _cnn_rnn_kernel,
        out_shape=jax.ShapeDtypeStruct((B, H4), jnp.float32),
        grid_spec=pltpu.PrefetchScalarGridSpec(
            num_scalar_prefetch=0,
            grid=(Bt,),
            in_specs=[
                pl.BlockSpec((None, T * TB, KC), lambda i: (i, 0, 0)),  # x windows
                pl.BlockSpec((KC, G), lambda i: (0, 0)),                # fused W_xg
                pl.BlockSpec((H2, G), lambda i: (0, 0)),                # GRU w_hh^T
                pl.BlockSpec((H2, H4), lambda i: (0, 0)),               # Linear w^T
                pl.BlockSpec((3, G), lambda i: (0, 0)),                 # packed biases
            ],
            out_specs=pl.BlockSpec((TB, H4), lambda i: (i, 0)),
            scratch_shapes=[pltpu.VMEM((T * TB, G), jnp.float32)],
        ),
        compiler_params=pltpu.CompilerParams(
            dimension_semantics=("parallel",)),      # batch axis -> v7x dual-TC
    )(x_blk, params["wxg"], params["whh"], params["wl"], params["b_all"])


def init_params(key, hidden):
    """Deterministic params in PyTorch shapes, packed into the fused kernel
    layout. Returns (kernel_params, ref_params) from the same random draws."""
    H, H2, H4 = hidden, 2 * hidden, 4 * hidden
    G = 3 * H2
    K, C = 3, 2
    ks = jax.random.split(key, 8)

    def u(k, shape, fan_in):
        b = 1.0 / math.sqrt(fan_in)
        return jax.random.uniform(k, shape, jnp.float32, -b, b)

    conv_w = u(ks[0], (H, C, K), C * K)       # Conv1d.weight (out, in, k)
    conv_b = u(ks[1], (H,), C * K)            # Conv1d.bias
    w_ih = u(ks[2], (G, H), H2)               # GRU.weight_ih_l0
    w_hh = u(ks[3], (G, H2), H2)              # GRU.weight_hh_l0
    b_ih = u(ks[4], (G,), H2)                 # GRU.bias_ih_l0
    b_hh = u(ks[5], (G,), H2)                 # GRU.bias_hh_l0
    lin_w = u(ks[6], (H4, H2), H2)            # Linear.weight
    lin_b = u(ks[7], (H4,), H2)               # Linear.bias

    # Conv weight packed so row (k*C + c) multiplies x[b, t+k, c]:
    wc_packed = jnp.transpose(conv_w, (2, 1, 0)).reshape(K * C, H)   # (K*C, H)
    wih_t = w_ih.T                                                   # (H, G)
    whh_t = w_hh.T                                                   # (H2, G)
    wl_t = lin_w.T                                                   # (H2, H4)

    # Algebraic Conv1d + GRU-input-projection fusion (composed in f32):
    #   gi = x_cat @ (wc @ wih^T) + (conv_b @ wih^T + b_ih)
    w_xg = wc_packed @ wih_t                                         # (K*C, G)
    b_xg = conv_b @ wih_t + b_ih                                     # (G,)
    # Fold the r/z thirds of b_hh into the input bias (PyTorch GRU semantics);
    # only the n-third must stay inside the r * (...) term.
    b_xg = b_xg.at[:2 * H2].add(b_hh[:2 * H2])
    b_hn = b_hh[2 * H2:]

    # Pack the remaining bias vectors into one lane-dense slab (one DMA).
    b_all = jnp.zeros((3, G), jnp.float32)
    b_all = b_all.at[0, :].set(b_xg)
    b_all = b_all.at[1, :H2].set(b_hn)
    b_all = b_all.at[2, :H4].set(lin_b)

    kernel_params = {
        "wxg": w_xg.astype(jnp.bfloat16),          # (K*C, 3*H2) fused weight
        "whh": whh_t.astype(jnp.bfloat16),         # (H2, 3*H2)
        "wl": wl_t.astype(jnp.bfloat16),           # (H2, H4)
        "b_all": b_all,                            # (3, 3*H2) f32
    }
    ref_params = {
        "wc": jnp.transpose(conv_w, (2, 1, 0)),    # (K, C, H) f32
        "bc": conv_b.reshape(1, H),
        "wih": wih_t, "whh": whh_t,
        "bih": b_ih.reshape(1, G), "bhh": b_hh.reshape(1, G),
        "wl": wl_t, "bl": lin_b.reshape(1, H4),
    }
    return kernel_params, ref_params


def cnn_rnn_reference(x, p):
    """Pure-JAX f32 mirror of the PyTorch forward (unfused)."""
    K, _, H = p["wc"].shape
    B, L, _ = x.shape
    T = L - (K - 1)
    H2 = p["whh"].shape[0]

    conv = sum(jnp.einsum("btc,ch->bth", x[:, k:k + T, :], p["wc"][k])
               for k in range(K)) + p["bc"]                          # (B, T, H)
    gi = jnp.einsum("bth,hg->btg", conv, p["wih"]) + p["bih"]

    h = jnp.zeros((B, H2), jnp.float32)
    for t in range(T):
        gh = h @ p["whh"] + p["bhh"]
        gi_t = gi[:, t, :]
        r = jax.nn.sigmoid(gi_t[:, :H2] + gh[:, :H2])
        z = jax.nn.sigmoid(gi_t[:, H2:2 * H2] + gh[:, H2:2 * H2])
        n = jnp.tanh(gi_t[:, 2 * H2:] + r * gh[:, 2 * H2:])
        h = (1.0 - z) * n + z * h
    return h @ p["wl"] + p["bl"]


if __name__ == "__main__":
    hidden = 32
    B, L, C = 8, 16, 2            # batch=8 fills a full sublane tile

    key = jax.random.PRNGKey(0)
    kx, kp = jax.random.split(key)
    x = jax.random.normal(kx, (B, L, C), jnp.float32)
    kparams, rparams = init_params(kp, hidden)

    out = jax.block_until_ready(cnn_rnn_forward(x, kparams))
    assert out.shape == (B, 4 * hidden), out.shape

    ref = cnn_rnn_reference(x, rparams)
    # Kernel feeds the MXU bf16 operands (f32 accumulation) and the fused
    # W_xg is cast to bf16 after f32 composition; the f32 reference plus the
    # 14-step recurrence motivates the relaxed tolerance.
    assert jnp.allclose(out, ref, rtol=3e-2, atol=3e-2), (
        float(jnp.max(jnp.abs(out - ref))))

    print("KERNEL_OK")
</pallas_src>

<mosaic_0001>
module attributes {stable_mosaic.version = 11 : i64} {
  func.func @_cnn_rnn_kernel(%arg0: i32, %arg1: memref<1x112x6xf32, #tpu.memory_space<vmem>>, %arg2: memref<6x192xbf16, #tpu.memory_space<vmem>>, %arg3: memref<64x192xbf16, #tpu.memory_space<vmem>>, %arg4: memref<64x128xbf16, #tpu.memory_space<vmem>>, %arg5: memref<3x192xf32, #tpu.memory_space<vmem>>, %arg6: memref<8x128xf32, #tpu.memory_space<vmem>>, %arg7: memref<112x192xf32, #tpu.memory_space<vmem>>) attributes {dimension_semantics = [#tpu.dimension_semantics<parallel>], iteration_bounds = array<i64: 1>, scalar_prefetch = 0 : i64, scratch_operands = 1 : i64, tpu.core_type = #tpu.core_type<tc>, window_params = [{transform_indices = @transform_0, window_bounds = array<i64: 1, 112, 6>}, {pipeline_mode = #tpu.pipeline_mode<synchronous>, transform_indices = @transform_1, window_bounds = array<i64: 6, 192>}, {pipeline_mode = #tpu.pipeline_mode<synchronous>, transform_indices = @transform_2, window_bounds = array<i64: 64, 192>}, {pipeline_mode = #tpu.pipeline_mode<synchronous>, transform_indices = @transform_3, window_bounds = array<i64: 64, 128>}, {pipeline_mode = #tpu.pipeline_mode<synchronous>, transform_indices = @transform_4, window_bounds = array<i64: 3, 192>}, {transform_indices = @transform_5, window_bounds = array<i64: 8, 128>}]} {
    %c0 = arith.constant 0 : index
    %c0_0 = arith.constant 0 : index
    %0 = vector.load %arg5[%c0, %c0_0] : memref<3x192xf32, #tpu.memory_space<vmem>>, vector<1x192xf32>
    %c1 = arith.constant 1 : index
    %c0_1 = arith.constant 0 : index
    %1 = vector.load %arg5[%c1, %c0_1] : memref<3x192xf32, #tpu.memory_space<vmem>>, vector<1x64xf32>
    %c2 = arith.constant 2 : index
    %c0_2 = arith.constant 0 : index
    %2 = vector.load %arg5[%c2, %c0_2] : memref<3x192xf32, #tpu.memory_space<vmem>>, vector<1x128xf32>
    %c0_3 = arith.constant 0 : index
    %c0_4 = arith.constant 0 : index
    %c0_5 = arith.constant 0 : index
    %3 = vector.load %arg1[%c0_3, %c0_4, %c0_5] : memref<1x112x6xf32, #tpu.memory_space<vmem>>, vector<1x112x6xf32>
    %4 = vector.shape_cast %3 : vector<1x112x6xf32> to vector<112x6xf32>
    %5 = arith.truncf %4 : vector<112x6xf32> to vector<112x6xbf16>
    %c0_6 = arith.constant 0 : index
    %c0_7 = arith.constant 0 : index
    %6 = vector.load %arg2[%c0_6, %c0_7] : memref<6x192xbf16, #tpu.memory_space<vmem>>, vector<6x192xbf16>
    %cst = arith.constant dense<0.000000e+00> : vector<112x192xf32>
    %7 = tpu.matmul %5, %6, %cst {dimension_numbers = #tpu.dot_dimension_numbers<[1], [0], [0], [1], [0, 0, 1, 1], [], []>} : vector<112x6xbf16>, vector<6x192xbf16>, vector<112x192xf32> -> vector<112x192xf32>
    %8 = vector.broadcast %0 : vector<1x192xf32> to vector<112x192xf32>
    %9 = arith.addf %7, %8 : vector<112x192xf32>
    %c0_8 = arith.constant 0 : index
    %c0_9 = arith.constant 0 : index
    %10 = vector.load %arg7[%c0_8, %c0_9] : memref<112x192xf32, #tpu.memory_space<vmem>>, vector<112x192xf32>
    tpu.vector_store %arg7[%c0_8, %c0_9], %9 {strides = array<i32>} : memref<112x192xf32, #tpu.memory_space<vmem>>, vector<112x192xf32>,
    %c0_10 = arith.constant 0 : index
    %c0_11 = arith.constant 0 : index
    %11 = vector.load %arg3[%c0_10, %c0_11] : memref<64x192xbf16, #tpu.memory_space<vmem>>, vector<64x192xbf16>
    %12 = vector.shape_cast %1 : vector<1x64xf32> to vector<1x64xf32>
    %13 = vector.broadcast %12 : vector<1x64xf32> to vector<8x64xf32>
    %c0_12 = arith.constant 0 : index
    %c0_13 = arith.constant 0 : index
    %14 = vector.load %arg7[%c0_12, %c0_13] : memref<112x192xf32, #tpu.memory_space<vmem>>, vector<8x192xf32>
    %15 = vector.extract_strided_slice %14 {offsets = [0, 0], sizes = [8, 64], strides = [1, 1]} : vector<8x192xf32> to vector<8x64xf32>
    %16 = arith.negf %15 : vector<8x64xf32>
    %17 = math.exp %16 : vector<8x64xf32>
    %cst_14 = arith.constant 1.000000e+00 : f32
    %18 = vector.broadcast %cst_14 : f32 to vector<8x64xf32>
    %19 = arith.addf %18, %17 : vector<8x64xf32>
    %20 = arith.divf %18, %19 : vector<8x64xf32>
    %21 = vector.extract_strided_slice %14 {offsets = [0, 64], sizes = [8, 64], strides = [1, 1]} : vector<8x192xf32> to vector<8x64xf32>
    %22 = arith.negf %21 : vector<8x64xf32>
    %23 = math.exp %22 : vector<8x64xf32>
    %cst_15 = arith.constant 1.000000e+00 : f32
    %24 = vector.broadcast %cst_15 : f32 to vector<8x64xf32>
    %25 = arith.addf %24, %23 : vector<8x64xf32>
    %26 = arith.divf %24, %25 : vector<8x64xf32>
    %27 = vector.extract_strided_slice %14 {offsets = [0, 128], sizes = [8, 64], strides = [1, 1]} : vector<8x192xf32> to vector<8x64xf32>
    %28 = arith.mulf %20, %13 : vector<8x64xf32>
    %29 = arith.addf %27, %28 : vector<8x64xf32>
    %30 = math.tanh %29 : vector<8x64xf32>
    %cst_16 = arith.constant 1.000000e+00 : f32
    %31 = vector.broadcast %cst_16 : f32 to vector<8x64xf32>
    %32 = arith.subf %31, %26 : vector<8x64xf32>
    %33 = arith.mulf %32, %30 : vector<8x64xf32>
    %c8 = arith.constant 8 : index
    %c0_17 = arith.constant 0 : index
    %34 = vector.load %arg7[%c8, %c0_17] : memref<112x192xf32, #tpu.memory_space<vmem>>, vector<8x192xf32>
    %35 = arith.truncf %33 : vector<8x64xf32> to vector<8x64xbf16>
    %cst_18 = arith.constant dense<0.000000e+00> : vector<8x192xf32>
    %36 = tpu.matmul %35, %11, %cst_18 {dimension_numbers = #tpu.dot_dimension_numbers<[1], [0], [0], [1], [0, 0, 1, 1], [], []>} : vector<8x64xbf16>, vector<64x192xbf16>, vector<8x192xf32> -> vector<8x192xf32>
    %37 = vector.extract_strided_slice %34 {offsets = [0, 0], sizes = [8, 64], strides = [1, 1]} : vector<8x192xf32> to vector<8x64xf32>
    %38 = vector.extract_strided_slice %36 {offsets = [0, 0], sizes = [8, 64], strides = [1, 1]} : vector<8x192xf32> to vector<8x64xf32>
    %39 = arith.addf %37, %38 : vector<8x64xf32>
    %40 = arith.negf %39 : vector<8x64xf32>
    %41 = math.exp %40 : vector<8x64xf32>
    %cst_19 = arith.constant 1.000000e+00 : f32
    %42 = vector.broadcast %cst_19 : f32 to vector<8x64xf32>
    %43 = arith.addf %42, %41 : vector<8x64xf32>
    %44 = arith.divf %42, %43 : vector<8x64xf32>
    %45 = vector.extract_strided_slice %34 {offsets = [0, 64], sizes = [8, 64], strides = [1, 1]} : vector<8x192xf32> to vector<8x64xf32>
    %46 = vector.extract_strided_slice %36 {offsets = [0, 64], sizes = [8, 64], strides = [1, 1]} : vector<8x192xf32> to vector<8x64xf32>
    %47 = arith.addf %45, %46 : vector<8x64xf32>
    %48 = arith.negf %47 : vector<8x64xf32>
    %49 = math.exp %48 : vector<8x64xf32>
    %cst_20 = arith.constant 1.000000e+00 : f32
    %50 = vector.broadcast %cst_20 : f32 to vector<8x64xf32>
    %51 = arith.addf %50, %49 : vector<8x64xf32>
    %52 = arith.divf %50, %51 : vector<8x64xf32>
    %53 = vector.extract_strided_slice %34 {offsets = [0, 128], sizes = [8, 64], strides = [1, 1]} : vector<8x192xf32> to vector<8x64xf32>
    %54 = vector.extract_strided_slice %36 {offsets = [0, 128], sizes = [8, 64], strides = [1, 1]} : vector<8x192xf32> to vector<8x64xf32>
    %55 = arith.addf %54, %13 : vector<8x64xf32>
    %56 = arith.mulf %44, %55 : vector<8x64xf32>
    %57 = arith.addf %53, %56 : vector<8x64xf32>
    %58 = math.tanh %57 : vector<8x64xf32>
    %cst_21 = arith.constant 1.000000e+00 : f32
    %59 = vector.broadcast %cst_21 : f32 to vector<8x64xf32>
    %60 = arith.subf %59, %52 : vector<8x64xf32>
    %61 = arith.mulf %60, %58 : vector<8x64xf32>
    %62 = arith.mulf %52, %33 : vector<8x64xf32>
    %63 = arith.addf %61, %62 : vector<8x64xf32>
    %c16 = arith.constant 16 : index
    %c0_22 = arith.constant 0 : index
    %64 = vector.load %arg7[%c16, %c0_22] : memref<112x192xf32, #tpu.memory_space<vmem>>, vector<8x192xf32>
    %65 = arith.truncf %63 : vector<8x64xf32> to vector<8x64xbf16>
    %cst_23 = arith.constant dense<0.000000e+00> : vector<8x192xf32>
    %66 = tpu.matmul %65, %11, %cst_23 {dimension_numbers = #tpu.dot_dimension_numbers<[1], [0], [0], [1], [0, 0, 1, 1], [], []>} : vector<8x64xbf16>, vector<64x192xbf16>, vector<8x192xf32> -> vector<8x192xf32>
    %67 = vector.extract_strided_slice %64 {offsets = [0, 0], sizes = [8, 64], strides = [1, 1]} : vector<8x192xf32> to vector<8x64xf32>
    %68 = vector.extract_strided_slice %66 {offsets = [0, 0], sizes = [8, 64], strides = [1, 1]} : vector<8x192xf32> to vector<8x64xf32>
    %69 = arith.addf %67, %68 : vector<8x64xf32>
    %70 = arith.negf %69 : vector<8x64xf32>
    %71 = math.exp %70 : vector<8x64xf32>
    %cst_24 = arith.constant 1.000000e+00 : f32
    %72 = vector.broadcast %cst_24 : f32 to vector<8x64xf32>
    %73 = arith.addf %72, %71 : vector<8x64xf32>
    %74 = arith.divf %72, %73 : vector<8x64xf32>
    %75 = vector.extract_strided_slice %64 {offsets = [0, 64], sizes = [8, 64], strides = [1, 1]} : vector<8x192xf32> to vector<8x64xf32>
    %76 = vector.extract_strided_slice %66 {offsets = [0, 64], sizes = [8, 64], strides = [1, 1]} : vector<8x192xf32> to vector<8x64xf32>
    %77 = arith.addf %75, %76 : vector<8x64xf32>
    %78 = arith.negf %77 : vector<8x64xf32>
    %79 = math.exp %78 : vector<8x64xf32>
    %cst_25 = arith.constant 1.000000e+00 : f32
    %80 = vector.broadcast %cst_25 : f32 to vector<8x64xf32>
    %81 = arith.addf %80, %79 : vector<8x64xf32>
    %82 = arith.divf %80, %81 : vector<8x64xf32>
    %83 = vector.extract_strided_slice %64 {offsets = [0, 128], sizes = [8, 64], strides = [1, 1]} : vector<8x192xf32> to vector<8x64xf32>
    %84 = vector.extract_strided_slice %66 {offsets = [0, 128], sizes = [8, 64], strides = [1, 1]} : vector<8x192xf32> to vector<8x64xf32>
    %85 = arith.addf %84, %13 : vector<8x64xf32>
    %86 = arith.mulf %74, %85 : vector<8x64xf32>
    %87 = arith.addf %83, %86 : vector<8x64xf32>
    %88 = math.tanh %87 : vector<8x64xf32>
    %cst_26 = arith.constant 1.000000e+00 : f32
    %89 = vector.broadcast %cst_26 : f32 to vector<8x64xf32>
    %90 = arith.subf %89, %82 : vector<8x64xf32>
    %91 = arith.mulf %90, %88 : vector<8x64xf32>
    %92 = arith.mulf %82, %63 : vector<8x64xf32>
    %93 = arith.addf %91, %92 : vector<8x64xf32>
    %c24 = arith.constant 24 : index
    %c0_27 = arith.constant 0 : index
    %94 = vector.load %arg7[%c24, %c0_27] : memref<112x192xf32, #tpu.memory_space<vmem>>, vector<8x192xf32>
    %95 = arith.truncf %93 : vector<8x64xf32> to vector<8x64xbf16>
    %cst_28 = arith.constant dense<0.000000e+00> : vector<8x192xf32>
    %96 = tpu.matmul %95, %11, %cst_28 {dimension_numbers = #tpu.dot_dimension_numbers<[1], [0], [0], [1], [0, 0, 1, 1], [], []>} : vector<8x64xbf16>, vector<64x192xbf16>, vector<8x192xf32> -> vector<8x192xf32>
    %97 = vector.extract_strided_slice %94 {offsets = [0, 0], sizes = [8, 64], strides = [1, 1]} : vector<8x192xf32> to vector<8x64xf32>
    %98 = vector.extract_strided_slice %96 {offsets = [0, 0], sizes = [8, 64], strides = [1, 1]} : vector<8x192xf32> to vector<8x64xf32>
    %99 = arith.addf %97, %98 : vector<8x64xf32>
    %100 = arith.negf %99 : vector<8x64xf32>
    %101 = math.exp %100 : vector<8x64xf32>
    %cst_29 = arith.constant 1.000000e+00 : f32
    %102 = vector.broadcast %cst_29 : f32 to vector<8x64xf32>
    %103 = arith.addf %102, %101 : vector<8x64xf32>
    %104 = arith.divf %102, %103 : vector<8x64xf32>
    %105 = vector.extract_strided_slice %94 {offsets = [0, 64], sizes = [8, 64], strides = [1, 1]} : vector<8x192xf32> to vector<8x64xf32>
    %106 = vector.extract_strided_slice %96 {offsets = [0, 64], sizes = [8, 64], strides = [1, 1]} : vector<8x192xf32> to vector<8x64xf32>
    %107 = arith.addf %105, %106 : vector<8x64xf32>
    %108 = arith.negf %107 : vector<8x64xf32>
    %109 = math.exp %108 : vector<8x64xf32>
    %cst_30 = arith.constant 1.000000e+00 : f32
    %110 = vector.broadcast %cst_30 : f32 to vector<8x64xf32>
    %111 = arith.addf %110, %109 : vector<8x64xf32>
    %112 = arith.divf %110, %111 : vector<8x64xf32>
    %113 = vector.extract_strided_slice %94 {offsets = [0, 128], sizes = [8, 64], strides = [1, 1]} : vector<8x192xf32> to vector<8x64xf32>
    %114 = vector.extract_strided_slice %96 {offsets = [0, 128], sizes = [8, 64], strides = [1, 1]} : vector<8x192xf32> to vector<8x64xf32>
    %115 = arith.addf %114, %13 : vector<8x64xf32>
    %116 = arith.mulf %104, %115 : vector<8x64xf32>
    %117 = arith.addf %113, %116 : vector<8x64xf32>
    %118 = math.tanh %117 : vector<8x64xf32>
    %cst_31 = arith.constant 1.000000e+00 : f32
    %119 = vector.broadcast %cst_31 : f32 to vector<8x64xf32>
    %120 = arith.subf %119, %112 : vector<8x64xf32>
    %121 = arith.mulf %120, %118 : vector<8x64xf32>
    %122 = arith.mulf %112, %93 : vector<8x64xf32>
    %123 = arith.addf %121, %122 : vector<8x64xf32>
    %c32 = arith.constant 32 : index
    %c0_32 = arith.constant 0 : index
    %124 = vector.load %arg7[%c32, %c0_32] : memref<112x192xf32, #tpu.memory_space<vmem>>, vector<8x192xf32>
    %125 = arith.truncf %123 : vector<8x64xf32> to vector<8x64xbf16>
    %cst_33 = arith.constant dense<0.000000e+00> : vector<8x192xf32>
    %126 = tpu.matmul %125, %11, %cst_33 {dimension_numbers = #tpu.dot_dimension_numbers<[1], [0], [0], [1], [0, 0, 1, 1], [], []>} : vector<8x64xbf16>, vector<64x192xbf16>, vector<8x192xf32> -> vector<8x192xf32>
    %127 = vector.extract_strided_slice %124 {offsets = [0, 0], sizes = [8, 64], strides = [1, 1]} : vector<8x192xf32> to vector<8x64xf32>
    %128 = vector.extract_strided_slice %126 {offsets = [0, 0], sizes = [8, 64], strides = [1, 1]} : vector<8x192xf32> to vector<8x64xf32>
    %129 = arith.addf %127, %128 : vector<8x64xf32>
    %130 = arith.negf %129 : vector<8x64xf32>
    %131 = math.exp %130 : vector<8x64xf32>
    %cst_34 = arith.constant 1.000000e+00 : f32
    %132 = vector.broadcast %cst_34 : f32 to vector<8x64xf32>
    %133 = arith.addf %132, %131 : vector<8x64xf32>
    %134 = arith.divf %132, %133 : vector<8x64xf32>
    %135 = vector.extract_strided_slice %124 {offsets = [0, 64], sizes = [8, 64], strides = [1, 1]} : vector<8x192xf32> to vector<8x64xf32>
    %136 = vector.extract_strided_slice %126 {offsets = [0, 64], sizes = [8, 64], strides = [1, 1]} : vector<8x192xf32> to vector<8x64xf32>
    %137 = arith.addf %135, %136 : vector<8x64xf32>
    %138 = arith.negf %137 : vector<8x64xf32>
    %139 = math.exp %138 : vector<8x64xf32>
    %cst_35 = arith.constant 1.000000e+00 : f32
    %140 = vector.broadcast %cst_35 : f32 to vector<8x64xf32>
    %141 = arith.addf %140, %139 : vector<8x64xf32>
    %142 = arith.divf %140, %141 : vector<8x64xf32>
    %143 = vector.extract_strided_slice %124 {offsets = [0, 128], sizes = [8, 64], strides = [1, 1]} : vector<8x192xf32> to vector<8x64xf32>
    %144 = vector.extract_strided_slice %126 {offsets = [0, 128], sizes = [8, 64], strides = [1, 1]} : vector<8x192xf32> to vector<8x64xf32>
    %145 = arith.addf %144, %13 : vector<8x64xf32>
    %146 = arith.mulf %134, %145 : vector<8x64xf32>
    %147 = arith.addf %143, %146 : vector<8x64xf32>
    %148 = math.tanh %147 : vector<8x64xf32>
    %cst_36 = arith.constant 1.000000e+00 : f32
    %149 = vector.broadcast %cst_36 : f32 to vector<8x64xf32>
    %150 = arith.subf %149, %142 : vector<8x64xf32>
    %151 = arith.mulf %150, %148 : vector<8x64xf32>
    %152 = arith.mulf %142, %123 : vector<8x64xf32>
    %153 = arith.addf %151, %152 : vector<8x64xf32>
    %c40 = arith.constant 40 : index
    %c0_37 = arith.constant 0 : index
    %154 = vector.load %arg7[%c40, %c0_37] : memref<112x192xf32, #tpu.memory_space<vmem>>, vector<8x192xf32>
    %155 = arith.truncf %153 : vector<8x64xf32> to vector<8x64xbf16>
    %cst_38 = arith.constant dense<0.000000e+00> : vector<8x192xf32>
    %156 = tpu.matmul %155, %11, %cst_38 {dimension_numbers = #tpu.dot_dimension_numbers<[1], [0], [0], [1], [0, 0, 1, 1], [], []>} : vector<8x64xbf16>, vector<64x192xbf16>, vector<8x192xf32> -> vector<8x192xf32>
    %157 = vector.extract_strided_slice %154 {offsets = [0, 0], sizes = [8, 64], strides = [1, 1]} : vector<8x192xf32> to vector<8x64xf32>
    %158 = vector.extract_strided_slice %156 {offsets = [0, 0], sizes = [8, 64], strides = [1, 1]} : vector<8x192xf32> to vector<8x64xf32>
    %159 = arith.addf %157, %158 : vector<8x64xf32>
    %160 = arith.negf %159 : vector<8x64xf32>
    %161 = math.exp %160 : vector<8x64xf32>
    %cst_39 = arith.constant 1.000000e+00 : f32
    %162 = vector.broadcast %cst_39 : f32 to vector<8x64xf32>
    %163 = arith.addf %162, %161 : vector<8x64xf32>
    %164 = arith.divf %162, %163 : vector<8x64xf32>
    %165 = vector.extract_strided_slice %154 {offsets = [0, 64], sizes = [8, 64], strides = [1, 1]} : vector<8x192xf32> to vector<8x64xf32>
    %166 = vector.extract_strided_slice %156 {offsets = [0, 64], sizes = [8, 64], strides = [1, 1]} : vector<8x192xf32> to vector<8x64xf32>
    %167 = arith.addf %165, %166 : vector<8x64xf32>
    %168 = arith.negf %167 : vector<8x64xf32>
    %169 = math.exp %168 : vector<8x64xf32>
    %cst_40 = arith.constant 1.000000e+00 : f32
    %170 = vector.broadcast %cst_40 : f32 to vector<8x64xf32>
    %171 = arith.addf %170, %169 : vector<8x64xf32>
    %172 = arith.divf %170, %171 : vector<8x64xf32>
    %173 = vector.extract_strided_slice %154 {offsets = [0, 128], sizes = [8, 64], strides = [1, 1]} : vector<8x192xf32> to vector<8x64xf32>
    %174 = vector.extract_strided_slice %156 {offsets = [0, 128], sizes = [8, 64], strides = [1, 1]} : vector<8x192xf32> to vector<8x64xf32>
    %175 = arith.addf %174, %13 : vector<8x64xf32>
    %176 = arith.mulf %164, %175 : vector<8x64xf32>
    %177 = arith.addf %173, %176 : vector<8x64xf32>
    %178 = math.tanh %177 : vector<8x64xf32>
    %cst_41 = arith.constant 1.000000e+00 : f32
    %179 = vector.broadcast %cst_41 : f32 to vector<8x64xf32>
    %180 = arith.subf %179, %172 : vector<8x64xf32>
    %181 = arith.mulf %180, %178 : vector<8x64xf32>
    %182 = arith.mulf %172, %153 : vector<8x64xf32>
    %183 = arith.addf %181, %182 : vector<8x64xf32>
    %c48 = arith.constant 48 : index
    %c0_42 = arith.constant 0 : index
    %184 = vector.load %arg7[%c48, %c0_42] : memref<112x192xf32, #tpu.memory_space<vmem>>, vector<8x192xf32>
    %185 = arith.truncf %183 : vector<8x64xf32> to vector<8x64xbf16>
    %cst_43 = arith.constant dense<0.000000e+00> : vector<8x192xf32>
    %186 = tpu.matmul %185, %11, %cst_43 {dimension_numbers = #tpu.dot_dimension_numbers<[1], [0], [0], [1], [0, 0, 1, 1], [], []>} : vector<8x64xbf16>, vector<64x192xbf16>, vector<8x192xf32> -> vector<8x192xf32>
    %187 = vector.extract_strided_slice %184 {offsets = [0, 0], sizes = [8, 64], strides = [1, 1]} : vector<8x192xf32> to vector<8x64xf32>
    %188 = vector.extract_strided_slice %186 {offsets = [0, 0], sizes = [8, 64], strides = [1, 1]} : vector<8x192xf32> to vector<8x64xf32>
    %189 = arith.addf %187, %188 : vector<8x64xf32>
    %190 = arith.negf %189 : vector<8x64xf32>
    %191 = math.exp %190 : vector<8x64xf32>
    %cst_44 = arith.constant 1.000000e+00 : f32
    %192 = vector.broadcast %cst_44 : f32 to vector<8x64xf32>
    %193 = arith.addf %192, %191 : vector<8x64xf32>
    %194 = arith.divf %192, %193 : vector<8x64xf32>
    %195 = vector.extract_strided_slice %184 {offsets = [0, 64], sizes = [8, 64], strides = [1, 1]} : vector<8x192xf32> to vector<8x64xf32>
    %196 = vector.extract_strided_slice %186 {offsets = [0, 64], sizes = [8, 64], strides = [1, 1]} : vector<8x192xf32> to vector<8x64xf32>
    %197 = arith.addf %195, %196 : vector<8x64xf32>
    %198 = arith.negf %197 : vector<8x64xf32>
    %199 = math.exp %198 : vector<8x64xf32>
    %cst_45 = arith.constant 1.000000e+00 : f32
    %200 = vector.broadcast %cst_45 : f32 to vector<8x64xf32>
    %201 = arith.addf %200, %199 : vector<8x64xf32>
    %202 = arith.divf %200, %201 : vector<8x64xf32>
    %203 = vector.extract_strided_slice %184 {offsets = [0, 128], sizes = [8, 64], strides = [1, 1]} : vector<8x192xf32> to vector<8x64xf32>
    %204 = vector.extract_strided_slice %186 {offsets = [0, 128], sizes = [8, 64], strides = [1, 1]} : vector<8x192xf32> to vector<8x64xf32>
    %205 = arith.addf %204, %13 : vector<8x64xf32>
    %206 = arith.mulf %194, %205 : vector<8x64xf32>
    %207 = arith.addf %203, %206 : vector<8x64xf32>
    %208 = math.tanh %207 : vector<8x64xf32>
    %cst_46 = arith.constant 1.000000e+00 : f32
    %209 = vector.broadcast %cst_46 : f32 to vector<8x64xf32>
    %210 = arith.subf %209, %202 : vector<8x64xf32>
    %211 = arith.mulf %210, %208 : vector<8x64xf32>
    %212 = arith.mulf %202, %183 : vector<8x64xf32>
    %213 = arith.addf %211, %212 : vector<8x64xf32>
    %c56 = arith.constant 56 : index
    %c0_47 = arith.constant 0 : index
    %214 = vector.load %arg7[%c56, %c0_47] : memref<112x192xf32, #tpu.memory_space<vmem>>, vector<8x192xf32>
    %215 = arith.truncf %213 : vector<8x64xf32> to vector<8x64xbf16>
    %cst_48 = arith.constant dense<0.000000e+00> : vector<8x192xf32>
    %216 = tpu.matmul %215, %11, %cst_48 {dimension_numbers = #tpu.dot_dimension_numbers<[1], [0], [0], [1], [0, 0, 1, 1], [], []>} : vector<8x64xbf16>, vector<64x192xbf16>, vector<8x192xf32> -> vector<8x192xf32>
    %217 = vector.extract_strided_slice %214 {offsets = [0, 0], sizes = [8, 64], strides = [1, 1]} : vector<8x192xf32> to vector<8x64xf32>
    %218 = vector.extract_strided_slice %216 {offsets = [0, 0], sizes = [8, 64], strides = [1, 1]} : vector<8x192xf32> to vector<8x64xf32>
    %219 = arith.addf %217, %218 : vector<8x64xf32>
    %220 = arith.negf %219 : vector<8x64xf32>
    %221 = math.exp %220 : vector<8x64xf32>
    %cst_49 = arith.constant 1.000000e+00 : f32
    %222 = vector.broadcast %cst_49 : f32 to vector<8x64xf32>
    %223 = arith.addf %222, %221 : vector<8x64xf32>
    %224 = arith.divf %222, %223 : vector<8x64xf32>
    %225 = vector.extract_strided_slice %214 {offsets = [0, 64], sizes = [8, 64], strides = [1, 1]} : vector<8x192xf32> to vector<8x64xf32>
    %226 = vector.extract_strided_slice %216 {offsets = [0, 64], sizes = [8, 64], strides = [1, 1]} : vector<8x192xf32> to vector<8x64xf32>
    %227 = arith.addf %225, %226 : vector<8x64xf32>
    %228 = arith.negf %227 : vector<8x64xf32>
    %229 = math.exp %228 : vector<8x64xf32>
    %cst_50 = arith.constant 1.000000e+00 : f32
    %230 = vector.broadcast %cst_50 : f32 to vector<8x64xf32>
    %231 = arith.addf %230, %229 : vector<8x64xf32>
    %232 = arith.divf %230, %231 : vector<8x64xf32>
    %233 = vector.extract_strided_slice %214 {offsets = [0, 128], sizes = [8, 64], strides = [1, 1]} : vector<8x192xf32> to vector<8x64xf32>
    %234 = vector.extract_strided_slice %216 {offsets = [0, 128], sizes = [8, 64], strides = [1, 1]} : vector<8x192xf32> to vector<8x64xf32>
    %235 = arith.addf %234, %13 : vector<8x64xf32>
    %236 = arith.mulf %224, %235 : vector<8x64xf32>
    %237 = arith.addf %233, %236 : vector<8x64xf32>
    %238 = math.tanh %237 : vector<8x64xf32>
    %cst_51 = arith.constant 1.000000e+00 : f32
    %239 = vector.broadcast %cst_51 : f32 to vector<8x64xf32>
    %240 = arith.subf %239, %232 : vector<8x64xf32>
    %241 = arith.mulf %240, %238 : vector<8x64xf32>
    %242 = arith.mulf %232, %213 : vector<8x64xf32>
    %243 = arith.addf %241, %242 : vector<8x64xf32>
    %c64 = arith.constant 64 : index
    %c0_52 = arith.constant 0 : index
    %244 = vector.load %arg7[%c64, %c0_52] : memref<112x192xf32, #tpu.memory_space<vmem>>, vector<8x192xf32>
    %245 = arith.truncf %243 : vector<8x64xf32> to vector<8x64xbf16>
    %cst_53 = arith.constant dense<0.000000e+00> : vector<8x192xf32>
    %246 = tpu.matmul %245, %11, %cst_53 {dimension_numbers = #tpu.dot_dimension_numbers<[1], [0], [0], [1], [0, 0, 1, 1], [], []>} : vector<8x64xbf16>, vector<64x192xbf16>, vector<8x192xf32> -> vector<8x192xf32>
    %247 = vector.extract_strided_slice %244 {offsets = [0, 0], sizes = [8, 64], strides = [1, 1]} : vector<8x192xf32> to vector<8x64xf32>
    %248 = vector.extract_strided_slice %246 {offsets = [0, 0], sizes = [8, 64], strides = [1, 1]} : vector<8x192xf32> to vector<8x64xf32>
    %249 = arith.addf %247, %248 : vector<8x64xf32>
    %250 = arith.negf %249 : vector<8x64xf32>
    %251 = math.exp %250 : vector<8x64xf32>
    %cst_54 = arith.constant 1.000000e+00 : f32
    %252 = vector.broadcast %cst_54 : f32 to vector<8x64xf32>
    %253 = arith.addf %252, %251 : vector<8x64xf32>
    %254 = arith.divf %252, %253 : vector<8x64xf32>
    %255 = vector.extract_strided_slice %244 {offsets = [0, 64], sizes = [8, 64], strides = [1, 1]} : vector<8x192xf32> to vector<8x64xf32>
    %256 = vector.extract_strided_slice %246 {offsets = [0, 64], sizes = [8, 64], strides = [1, 1]} : vector<8x192xf32> to vector<8x64xf32>
    %257 = arith.addf %255, %256 : vector<8x64xf32>
    %258 = arith.negf %257 : vector<8x64xf32>
    %259 = math.exp %258 : vector<8x64xf32>
    %cst_55 = arith.constant 1.000000e+00 : f32
    %260 = vector.broadcast %cst_55 : f32 to vector<8x64xf32>
    %261 = arith.addf %260, %259 : vector<8x64xf32>
    %262 = arith.divf %260, %261 : vector<8x64xf32>
    %263 = vector.extract_strided_slice %244 {offsets = [0, 128], sizes = [8, 64], strides = [1, 1]} : vector<8x192xf32> to vector<8x64xf32>
    %264 = vector.extract_strided_slice %246 {offsets = [0, 128], sizes = [8, 64], strides = [1, 1]} : vector<8x192xf32> to vector<8x64xf32>
    %265 = arith.addf %264, %13 : vector<8x64xf32>
    %266 = arith.mulf %254, %265 : vector<8x64xf32>
    %267 = arith.addf %263, %266 : vector<8x64xf32>
    %268 = math.tanh %267 : vector<8x64xf32>
    %cst_56 = arith.constant 1.000000e+00 : f32
    %269 = vector.broadcast %cst_56 : f32 to vector<8x64xf32>
    %270 = arith.subf %269, %262 : vector<8x64xf32>
    %271 = arith.mulf %270, %268 : vector<8x64xf32>
    %272 = arith.mulf %262, %243 : vector<8x64xf32>
    %273 = arith.addf %271, %272 : vector<8x64xf32>
    %c72 = arith.constant 72 : index
    %c0_57 = arith.constant 0 : index
    %274 = vector.load %arg7[%c72, %c0_57] : memref<112x192xf32, #tpu.memory_space<vmem>>, vector<8x192xf32>
    %275 = arith.truncf %273 : vector<8x64xf32> to vector<8x64xbf16>
    %cst_58 = arith.constant dense<0.000000e+00> : vector<8x192xf32>
    %276 = tpu.matmul %275, %11, %cst_58 {dimension_numbers = #tpu.dot_dimension_numbers<[1], [0], [0], [1], [0, 0, 1, 1], [], []>} : vector<8x64xbf16>, vector<64x192xbf16>, vector<8x192xf32> -> vector<8x192xf32>
    %277 = vector.extract_strided_slice %274 {offsets = [0, 0], sizes = [8, 64], strides = [1, 1]} : vector<8x192xf32> to vector<8x64xf32>
    %278 = vector.extract_strided_slice %276 {offsets = [0, 0], sizes = [8, 64], strides = [1, 1]} : vector<8x192xf32> to vector<8x64xf32>
    %279 = arith.addf %277, %278 : vector<8x64xf32>
    %280 = arith.negf %279 : vector<8x64xf32>
    %281 = math.exp %280 : vector<8x64xf32>
    %cst_59 = arith.constant 1.000000e+00 : f32
    %282 = vector.broadcast %cst_59 : f32 to vector<8x64xf32>
    %283 = arith.addf %282, %281 : vector<8x64xf32>
    %284 = arith.divf %282, %283 : vector<8x64xf32>
    %285 = vector.extract_strided_slice %274 {offsets = [0, 64], sizes = [8, 64], strides = [1, 1]} : vector<8x192xf32> to vector<8x64xf32>
    %286 = vector.extract_strided_slice %276 {offsets = [0, 64], sizes = [8, 64], strides = [1, 1]} : vector<8x192xf32> to vector<8x64xf32>
    %287 = arith.addf %285, %286 : vector<8x64xf32>
    %288 = arith.negf %287 : vector<8x64xf32>
    %289 = math.exp %288 : vector<8x64xf32>
    %cst_60 = arith.constant 1.000000e+00 : f32
    %290 = vector.broadcast %cst_60 : f32 to vector<8x64xf32>
    %291 = arith.addf %290, %289 : vector<8x64xf32>
    %292 = arith.divf %290, %291 : vector<8x64xf32>
    %293 = vector.extract_strided_slice %274 {offsets = [0, 128], sizes = [8, 64], strides = [1, 1]} : vector<8x192xf32> to vector<8x64xf32>
    %294 = vector.extract_strided_slice %276 {offsets = [0, 128], sizes = [8, 64], strides = [1, 1]} : vector<8x192xf32> to vector<8x64xf32>
    %295 = arith.addf %294, %13 : vector<8x64xf32>
    %296 = arith.mulf %284, %295 : vector<8x64xf32>
    %297 = arith.addf %293, %296 : vector<8x64xf32>
    %298 = math.tanh %297 : vector<8x64xf32>
    %cst_61 = arith.constant 1.000000e+00 : f32
    %299 = vector.broadcast %cst_61 : f32 to vector<8x64xf32>
    %300 = arith.subf %299, %292 : vector<8x64xf32>
    %301 = arith.mulf %300, %298 : vector<8x64xf32>
    %302 = arith.mulf %292, %273 : vector<8x64xf32>
    %303 = arith.addf %301, %302 : vector<8x64xf32>
    %c80 = arith.constant 80 : index
    %c0_62 = arith.constant 0 : index
    %304 = vector.load %arg7[%c80, %c0_62] : memref<112x192xf32, #tpu.memory_space<vmem>>, vector<8x192xf32>
    %305 = arith.truncf %303 : vector<8x64xf32> to vector<8x64xbf16>
    %cst_63 = arith.constant dense<0.000000e+00> : vector<8x192xf32>
    %306 = tpu.matmul %305, %11, %cst_63 {dimension_numbers = #tpu.dot_dimension_numbers<[1], [0], [0], [1], [0, 0, 1, 1], [], []>} : vector<8x64xbf16>, vector<64x192xbf16>, vector<8x192xf32> -> vector<8x192xf32>
    %307 = vector.extract_strided_slice %304 {offsets = [0, 0], sizes = [8, 64], strides = [1, 1]} : vector<8x192xf32> to vector<8x64xf32>
    %308 = vector.extract_strided_slice %306 {offsets = [0, 0], sizes = [8, 64], strides = [1, 1]} : vector<8x192xf32> to vector<8x64xf32>
    %309 = arith.addf %307, %308 : vector<8x64xf32>
    %310 = arith.negf %309 : vector<8x64xf32>
    %311 = math.exp %310 : vector<8x64xf32>
    %cst_64 = arith.constant 1.000000e+00 : f32
    %312 = vector.broadcast %cst_64 : f32 to vector<8x64xf32>
    %313 = arith.addf %312, %311 : vector<8x64xf32>
    %314 = arith.divf %312, %313 : vector<8x64xf32>
    %315 = vector.extract_strided_slice %304 {offsets = [0, 64], sizes = [8, 64], strides = [1, 1]} : vector<8x192xf32> to vector<8x64xf32>
    %316 = vector.extract_strided_slice %306 {offsets = [0, 64], sizes = [8, 64], strides = [1, 1]} : vector<8x192xf32> to vector<8x64xf32>
    %317 = arith.addf %315, %316 : vector<8x64xf32>
    %318 = arith.negf %317 : vector<8x64xf32>
    %319 = math.exp %318 : vector<8x64xf32>
    %cst_65 = arith.constant 1.000000e+00 : f32
    %320 = vector.broadcast %cst_65 : f32 to vector<8x64xf32>
    %321 = arith.addf %320, %319 : vector<8x64xf32>
    %322 = arith.divf %320, %321 : vector<8x64xf32>
    %323 = vector.extract_strided_slice %304 {offsets = [0, 128], sizes = [8, 64], strides = [1, 1]} : vector<8x192xf32> to vector<8x64xf32>
    %324 = vector.extract_strided_slice %306 {offsets = [0, 128], sizes = [8, 64], strides = [1, 1]} : vector<8x192xf32> to vector<8x64xf32>
    %325 = arith.addf %324, %13 : vector<8x64xf32>
    %326 = arith.mulf %314, %325 : vector<8x64xf32>
    %327 = arith.addf %323, %326 : vector<8x64xf32>
    %328 = math.tanh %327 : vector<8x64xf32>
    %cst_66 = arith.constant 1.000000e+00 : f32
    %329 = vector.broadcast %cst_66 : f32 to vector<8x64xf32>
    %330 = arith.subf %329, %322 : vector<8x64xf32>
    %331 = arith.mulf %330, %328 : vector<8x64xf32>
    %332 = arith.mulf %322, %303 : vector<8x64xf32>
    %333 = arith.addf %331, %332 : vector<8x64xf32>
    %c88 = arith.constant 88 : index
    %c0_67 = arith.constant 0 : index
    %334 = vector.load %arg7[%c88, %c0_67] : memref<112x192xf32, #tpu.memory_space<vmem>>, vector<8x192xf32>
    %335 = arith.truncf %333 : vector<8x64xf32> to vector<8x64xbf16>
    %cst_68 = arith.constant dense<0.000000e+00> : vector<8x192xf32>
    %336 = tpu.matmul %335, %11, %cst_68 {dimension_numbers = #tpu.dot_dimension_numbers<[1], [0], [0], [1], [0, 0, 1, 1], [], []>} : vector<8x64xbf16>, vector<64x192xbf16>, vector<8x192xf32> -> vector<8x192xf32>
    %337 = vector.extract_strided_slice %334 {offsets = [0, 0], sizes = [8, 64], strides = [1, 1]} : vector<8x192xf32> to vector<8x64xf32>
    %338 = vector.extract_strided_slice %336 {offsets = [0, 0], sizes = [8, 64], strides = [1, 1]} : vector<8x192xf32> to vector<8x64xf32>
    %339 = arith.addf %337, %338 : vector<8x64xf32>
    %340 = arith.negf %339 : vector<8x64xf32>
    %341 = math.exp %340 : vector<8x64xf32>
    %cst_69 = arith.constant 1.000000e+00 : f32
    %342 = vector.broadcast %cst_69 : f32 to vector<8x64xf32>
    %343 = arith.addf %342, %341 : vector<8x64xf32>
    %344 = arith.divf %342, %343 : vector<8x64xf32>
    %345 = vector.extract_strided_slice %334 {offsets = [0, 64], sizes = [8, 64], strides = [1, 1]} : vector<8x192xf32> to vector<8x64xf32>
    %346 = vector.extract_strided_slice %336 {offsets = [0, 64], sizes = [8, 64], strides = [1, 1]} : vector<8x192xf32> to vector<8x64xf32>
    %347 = arith.addf %345, %346 : vector<8x64xf32>
    %348 = arith.negf %347 : vector<8x64xf32>
    %349 = math.exp %348 : vector<8x64xf32>
    %cst_70 = arith.constant 1.000000e+00 : f32
    %350 = vector.broadcast %cst_70 : f32 to vector<8x64xf32>
    %351 = arith.addf %350, %349 : vector<8x64xf32>
    %352 = arith.divf %350, %351 : vector<8x64xf32>
    %353 = vector.extract_strided_slice %334 {offsets = [0, 128], sizes = [8, 64], strides = [1, 1]} : vector<8x192xf32> to vector<8x64xf32>
    %354 = vector.extract_strided_slice %336 {offsets = [0, 128], sizes = [8, 64], strides = [1, 1]} : vector<8x192xf32> to vector<8x64xf32>
    %355 = arith.addf %354, %13 : vector<8x64xf32>
    %356 = arith.mulf %344, %355 : vector<8x64xf32>
    %357 = arith.addf %353, %356 : vector<8x64xf32>
    %358 = math.tanh %357 : vector<8x64xf32>
    %cst_71 = arith.constant 1.000000e+00 : f32
    %359 = vector.broadcast %cst_71 : f32 to vector<8x64xf32>
    %360 = arith.subf %359, %352 : vector<8x64xf32>
    %361 = arith.mulf %360, %358 : vector<8x64xf32>
    %362 = arith.mulf %352, %333 : vector<8x64xf32>
    %363 = arith.addf %361, %362 : vector<8x64xf32>
    %c96 = arith.constant 96 : index
    %c0_72 = arith.constant 0 : index
    %364 = vector.load %arg7[%c96, %c0_72] : memref<112x192xf32, #tpu.memory_space<vmem>>, vector<8x192xf32>
    %365 = arith.truncf %363 : vector<8x64xf32> to vector<8x64xbf16>
    %cst_73 = arith.constant dense<0.000000e+00> : vector<8x192xf32>
    %366 = tpu.matmul %365, %11, %cst_73 {dimension_numbers = #tpu.dot_dimension_numbers<[1], [0], [0], [1], [0, 0, 1, 1], [], []>} : vector<8x64xbf16>, vector<64x192xbf16>, vector<8x192xf32> -> vector<8x192xf32>
    %367 = vector.extract_strided_slice %364 {offsets = [0, 0], sizes = [8, 64], strides = [1, 1]} : vector<8x192xf32> to vector<8x64xf32>
    %368 = vector.extract_strided_slice %366 {offsets = [0, 0], sizes = [8, 64], strides = [1, 1]} : vector<8x192xf32> to vector<8x64xf32>
    %369 = arith.addf %367, %368 : vector<8x64xf32>
    %370 = arith.negf %369 : vector<8x64xf32>
    %371 = math.exp %370 : vector<8x64xf32>
    %cst_74 = arith.constant 1.000000e+00 : f32
    %372 = vector.broadcast %cst_74 : f32 to vector<8x64xf32>
    %373 = arith.addf %372, %371 : vector<8x64xf32>
    %374 = arith.divf %372, %373 : vector<8x64xf32>
    %375 = vector.extract_strided_slice %364 {offsets = [0, 64], sizes = [8, 64], strides = [1, 1]} : vector<8x192xf32> to vector<8x64xf32>
    %376 = vector.extract_strided_slice %366 {offsets = [0, 64], sizes = [8, 64], strides = [1, 1]} : vector<8x192xf32> to vector<8x64xf32>
    %377 = arith.addf %375, %376 : vector<8x64xf32>
    %378 = arith.negf %377 : vector<8x64xf32>
    %379 = math.exp %378 : vector<8x64xf32>
    %cst_75 = arith.constant 1.000000e+00 : f32
    %380 = vector.broadcast %cst_75 : f32 to vector<8x64xf32>
    %381 = arith.addf %380, %379 : vector<8x64xf32>
    %382 = arith.divf %380, %381 : vector<8x64xf32>
    %383 = vector.extract_strided_slice %364 {offsets = [0, 128], sizes = [8, 64], strides = [1, 1]} : vector<8x192xf32> to vector<8x64xf32>
    %384 = vector.extract_strided_slice %366 {offsets = [0, 128], sizes = [8, 64], strides = [1, 1]} : vector<8x192xf32> to vector<8x64xf32>
    %385 = arith.addf %384, %13 : vector<8x64xf32>
    %386 = arith.mulf %374, %385 : vector<8x64xf32>
    %387 = arith.addf %383, %386 : vector<8x64xf32>
    %388 = math.tanh %387 : vector<8x64xf32>
    %cst_76 = arith.constant 1.000000e+00 : f32
    %389 = vector.broadcast %cst_76 : f32 to vector<8x64xf32>
    %390 = arith.subf %389, %382 : vector<8x64xf32>
    %391 = arith.mulf %390, %388 : vector<8x64xf32>
    %392 = arith.mulf %382, %363 : vector<8x64xf32>
    %393 = arith.addf %391, %392 : vector<8x64xf32>
    %c104 = arith.constant 104 : index
    %c0_77 = arith.constant 0 : index
    %394 = vector.load %arg7[%c104, %c0_77] : memref<112x192xf32, #tpu.memory_space<vmem>>, vector<8x192xf32>
    %395 = arith.truncf %393 : vector<8x64xf32> to vector<8x64xbf16>
    %cst_78 = arith.constant dense<0.000000e+00> : vector<8x192xf32>
    %396 = tpu.matmul %395, %11, %cst_78 {dimension_numbers = #tpu.dot_dimension_numbers<[1], [0], [0], [1], [0, 0, 1, 1], [], []>} : vector<8x64xbf16>, vector<64x192xbf16>, vector<8x192xf32> -> vector<8x192xf32>
    %397 = vector.extract_strided_slice %394 {offsets = [0, 0], sizes = [8, 64], strides = [1, 1]} : vector<8x192xf32> to vector<8x64xf32>
    %398 = vector.extract_strided_slice %396 {offsets = [0, 0], sizes = [8, 64], strides = [1, 1]} : vector<8x192xf32> to vector<8x64xf32>
    %399 = arith.addf %397, %398 : vector<8x64xf32>
    %400 = arith.negf %399 : vector<8x64xf32>
    %401 = math.exp %400 : vector<8x64xf32>
    %cst_79 = arith.constant 1.000000e+00 : f32
    %402 = vector.broadcast %cst_79 : f32 to vector<8x64xf32>
    %403 = arith.addf %402, %401 : vector<8x64xf32>
    %404 = arith.divf %402, %403 : vector<8x64xf32>
    %405 = vector.extract_strided_slice %394 {offsets = [0, 64], sizes = [8, 64], strides = [1, 1]} : vector<8x192xf32> to vector<8x64xf32>
    %406 = vector.extract_strided_slice %396 {offsets = [0, 64], sizes = [8, 64], strides = [1, 1]} : vector<8x192xf32> to vector<8x64xf32>
    %407 = arith.addf %405, %406 : vector<8x64xf32>
    %408 = arith.negf %407 : vector<8x64xf32>
    %409 = math.exp %408 : vector<8x64xf32>
    %cst_80 = arith.constant 1.000000e+00 : f32
    %410 = vector.broadcast %cst_80 : f32 to vector<8x64xf32>
    %411 = arith.addf %410, %409 : vector<8x64xf32>
    %412 = arith.divf %410, %411 : vector<8x64xf32>
    %413 = vector.extract_strided_slice %394 {offsets = [0, 128], sizes = [8, 64], strides = [1, 1]} : vector<8x192xf32> to vector<8x64xf32>
    %414 = vector.extract_strided_slice %396 {offsets = [0, 128], sizes = [8, 64], strides = [1, 1]} : vector<8x192xf32> to vector<8x64xf32>
    %415 = arith.addf %414, %13 : vector<8x64xf32>
    %416 = arith.mulf %404, %415 : vector<8x64xf32>
    %417 = arith.addf %413, %416 : vector<8x64xf32>
    %418 = math.tanh %417 : vector<8x64xf32>
    %cst_81 = arith.constant 1.000000e+00 : f32
    %419 = vector.broadcast %cst_81 : f32 to vector<8x64xf32>
    %420 = arith.subf %419, %412 : vector<8x64xf32>
    %421 = arith.mulf %420, %418 : vector<8x64xf32>
    %422 = arith.mulf %412, %393 : vector<8x64xf32>
    %423 = arith.addf %421, %422 : vector<8x64xf32>
    %424 = arith.truncf %423 : vector<8x64xf32> to vector<8x64xbf16>
    %c0_82 = arith.constant 0 : index
    %c0_83 = arith.constant 0 : index
    %425 = vector.load %arg4[%c0_82, %c0_83] : memref<64x128xbf16, #tpu.memory_space<vmem>>, vector<64x128xbf16>
    %cst_84 = arith.constant dense<0.000000e+00> : vector<8x128xf32>
    %426 = tpu.matmul %424, %425, %cst_84 {dimension_numbers = #tpu.dot_dimension_numbers<[1], [0], [0], [1], [0, 0, 1, 1], [], []>} : vector<8x64xbf16>, vector<64x128xbf16>, vector<8x128xf32> -> vector<8x128xf32>
    %427 = vector.broadcast %2 : vector<1x128xf32> to vector<8x128xf32>
    %428 = arith.addf %426, %427 : vector<8x128xf32>
    %c0_85 = arith.constant 0 : index
    %c0_86 = arith.constant 0 : index
    %429 = vector.load %arg6[%c0_85, %c0_86] : memref<8x128xf32, #tpu.memory_space<vmem>>, vector<8x128xf32>
    tpu.vector_store %arg6[%c0_85, %c0_86], %428 {strides = array<i32>} : memref<8x128xf32, #tpu.memory_space<vmem>>, vector<8x128xf32>,
    return
  }
  func.func @transform_0(%arg0: i32) -> (i32, i32, i32) {
    %c0_i32 = arith.constant 0 : i32
    %c0_i32_0 = arith.constant 0 : i32
    %c0_i32_1 = arith.constant 0 : i32
    return %arg0, %c0_i32, %c0_i32_0 : i32, i32, i32
  }
  func.func @transform_1(%arg0: i32) -> (i32, i32) {
    %c0_i32 = arith.constant 0 : i32
    %c0_i32_0 = arith.constant 0 : i32
    %c0_i32_1 = arith.constant 0 : i32
    return %c0_i32, %c0_i32_0 : i32, i32
  }
  func.func @transform_2(%arg0: i32) -> (i32, i32) {
    %c0_i32 = arith.constant 0 : i32
    %c0_i32_0 = arith.constant 0 : i32
    %c0_i32_1 = arith.constant 0 : i32
    return %c0_i32, %c0_i32_0 : i32, i32
  }
  func.func @transform_3(%arg0: i32) -> (i32, i32) {
    %c0_i32 = arith.constant 0 : i32
    %c0_i32_0 = arith.constant 0 : i32
    %c0_i32_1 = arith.constant 0 : i32
    return %c0_i32, %c0_i32_0 : i32, i32
  }
  func.func @transform_4(%arg0: i32) -> (i32, i32) {
    %c0_i32 = arith.constant 0 : i32
    %c0_i32_0 = arith.constant 0 : i32
    %c0_i32_1 = arith.constant 0 : i32
    return %c0_i32, %c0_i32_0 : i32, i32
  }
  func.func @transform_5(%arg0: i32) -> (i32, i32) {
    %c0_i32 = arith.constant 0 : i32
    %c0_i32_0 = arith.constant 0 : i32
    return %arg0, %c0_i32 : i32, i32
  }
}

</mosaic_0001>

<bundles_post_ra>
// kernel: tpu_custom_call.1
= control target key start
LH: loop header
LB: loop body
LE: loop exit
PB: predicated region body
PF: predicated region fallthrough
CT: control target
= control target key end

     0   :  { %vm79_vm0 = vcmask 1042432   ;;  %s1887_s0 = inlined_call_operand.vmem [shape: f32[1,112,6], index: 0, kind: input, shape index: {}]   ;;  %s1888_s1 = inlined_call_operand.vmem [shape: bf16[6,192], index: 1, kind: input, shape index: {}]   ;;  %s1889_s2 = inlined_call_operand.vmem [shape: bf16[64,192], index: 2, kind: input, shape index: {}]   ;;  %s1890_s3 = inlined_call_operand.vmem [shape: bf16[64,128], index: 3, kind: input, shape index: {}]   ;;  %s1891_s4 = inlined_call_operand.vmem [shape: f32[3,192], index: 4, kind: input, shape index: {}]   ;;  %s1892_s5 = inlined_call_operand.hbm [shape: f32[8,128], index: 5, kind: output, shape index: {}]  }
   0x1   :  { %v46_v0 = vld [vmem:[%s1888_s1] sm:$0x77]  ;;  %v26_v4 = vld [vmem:[%s1887_s0 + $0x8] sm:$0xff] }
   0x2   :  { %v53_v1 = vunpack.c.l.b16 %v46_v0  ;;  %v25_v2 = vld [vmem:[%s1887_s0] sm:$0xff]  ;;  %v54_v3 = vunpack.c.h.b16 %v46_v0 }
   0x3   :  { %10 = vsyncpa [#allocation4], 0  ;;  %v39_v8 = vpack.c.bf16 %v26_v4, %v25_v2  ;;  %vm57_vm1 = vcmask 48128   ;;  %v22_v10 = vld [vmem:[%s1891_s4] ss:$4 sm:$0x3] }
   0x4   :  { %v55_v5 = vpack.c.b16 %v53_v1, %v53_v1  ;;  %v56_v6 = vpack.c.b16 %v54_v3, %v54_v3  ;;  %v1499_v11 = vperm.slane %v22_v10, 0  ;;  %v1501_v12 = vperm.slane %v22_v10, 1  ;;  %v1514_v30 = vld [vmem:[%s1891_s4 + $0x1] ss:$0 sm:$0xff]  ;;  %s1453_s27 = smov 64   ;;  %s1454_s18 = smov [#allocation3]  }
   0x5   :  { %vm175_vm2 = vcmask 523264   ;;  %v1264_v39 = vld [vmem:[%s1889_s2 + $0x30] sm:$0xf]  ;;  %v1333_v40 = vld [vmem:[%s1889_s2 + $0x34] sm:$0xf0]  ;;  %s1212_s19 = sshll.u32 %s1454_s18, 4  ;;  %s1213_s19 = int_to_ptr.vmem [resolvable:$true] %s1212_s19 }
   0x6   :  { %v81_v7 = vsel %vm79_vm0, %v55_v5, 0  ;;  %v84_v9 = vsel %vm79_vm0, %v56_v6, 0  ;;  %v1332_v41 = vld [vmem:[%s1889_s2 + $0x34] sm:$0xf]  ;;  %v1527_v42 = vor.u32 %v1333_v40, %v1264_v39  ;;  %v1266_v43 = vld [vmem:[%s1889_s2 + $0x38] sm:$0xf0] }
   0x7   :  { %93 = vmatpush.bf16.msra.mxu0 %v81_v7  ;;  %137 = vmatpush.bf16.msra.mxu1 %v84_v9  ;;  %v1256_v44 = vld [vmem:[%s1889_s2 + $0x20] sm:$0xf]  ;;  %v1331_v45 = vld [vmem:[%s1889_s2 + $0x24] sm:$0xf0]  ;;  %v1538_v46 = vor.u32 %v1332_v41, %v1266_v43  ;;  %v1330_v47 = vld [vmem:[%s1889_s2 + $0x24] sm:$0xf] }
   0x8   :  { %v1258_v48 = vld [vmem:[%s1889_s2 + $0x28] sm:$0xf0]  ;;  %295 = vmatpush.bf16.msra.mxu2 %v1527_v42  ;;  %v1547_v49 = vor.u32 %v1331_v45, %v1256_v44  ;;  %v1248_v51 = vld [vmem:[%s1889_s2 + $0x10] sm:$0xf]  ;;  %v1329_v52 = vld [vmem:[%s1889_s2 + $0x14] sm:$0xf0] }
   0x9   :  { %308 = vmatpush.bf16.msra.mxu3 %v1538_v46  ;;  %v1551_v50 = vor.u32 %v1330_v47, %v1258_v48  ;;  %v1328_v53 = vld [vmem:[%s1889_s2 + $0x14] sm:$0xf]  ;;  %v1250_v54 = vld [vmem:[%s1889_s2 + $0x18] sm:$0xf0]  ;;  %v1567_v55 = vor.u32 %v1329_v52, %v1248_v51  ;;  %v1240_v57 = vld [vmem:[%s1889_s2] sm:$0xf] }
   0xa   :  { %1223 = vmatmul.msk.bf16.vlgmr.msra.gmra.mxu0 %vm57_vm1, %v39_v8  ;;  %1230 = vmatmul.msk.bf16.vlgmr.msra.gmra.mxu1 %vm57_vm1, %v39_v8  ;;  %v1571_v56 = vor.u32 %v1328_v53, %v1250_v54  ;;  %v1327_v58 = vld [vmem:[%s1889_s2 + $0x4] sm:$0xf0]  ;;  %v1326_v59 = vld [vmem:[%s1889_s2 + $0x4] sm:$0xf]  ;;  %v1242_v60 = vld [vmem:[%s1889_s2 + $0x8] sm:$0xf0] }
   0xb   :  { %764 = vmatpush.bf16.msrb.mxu0 %v1527_v42  ;;  %777 = vmatpush.bf16.msrb.mxu1 %v1538_v46  ;;  %v1587_v61 = vor.u32 %v1327_v58, %v1240_v57  ;;  %v1591_v62 = vor.u32 %v1326_v59, %v1242_v60  ;;  %s1214_s21 = sshll.u32 %s1892_s5, 4  ;;  %s1215_s21 = int_to_ptr.hbm [resolvable:$true] %s1214_s21 }
   0xc   :  { %296 = vmatpush.bf16.msra.mxu2 %v1547_v49 }
   0xd   :  { %309 = vmatpush.bf16.msra.mxu3 %v1551_v50 }
   0xf   :  { %765 = vmatpush.bf16.msrb.mxu0 %v1547_v49  ;;  %778 = vmatpush.bf16.msrb.mxu1 %v1551_v50 }
  0x10   :  { %297 = vmatpush.bf16.msra.mxu2 %v1567_v55 }
  0x11   :  { %310 = vmatpush.bf16.msra.mxu3 %v1571_v56 }
  0x13   :  { %766 = vmatpush.bf16.msrb.mxu0 %v1567_v55  ;;  %779 = vmatpush.bf16.msrb.mxu1 %v1571_v56 }
  0x14   :  { %298 = vmatpush.bf16.msra.mxu2 %v1587_v61 }
  0x15   :  { %311 = vmatpush.bf16.msra.mxu3 %v1591_v62 }
  0x17   :  { %767 = vmatpush.bf16.msrb.mxu0 %v1587_v61  ;;  %780 = vmatpush.bf16.msrb.mxu1 %v1591_v62 }
  0x18   :  { %362 = vmatpush.bf16.msrb.mxu2 %v1527_v42 }
  0x19   :  { %375 = vmatpush.bf16.msrb.mxu3 %v1538_v46 }
  0x1b   :  { %898 = vmatpush.bf16.msra.mxu0 %v1527_v42  ;;  %911 = vmatpush.bf16.msra.mxu1 %v1538_v46 }
  0x1c   :  { %363 = vmatpush.bf16.msrb.mxu2 %v1547_v49 }
  0x1d   :  { %376 = vmatpush.bf16.msrb.mxu3 %v1551_v50 }
  0x1f   :  { %899 = vmatpush.bf16.msra.mxu0 %v1547_v49  ;;  %912 = vmatpush.bf16.msra.mxu1 %v1551_v50 }
  0x20   :  { %364 = vmatpush.bf16.msrb.mxu2 %v1567_v55 }
  0x21   :  { %377 = vmatpush.bf16.msrb.mxu3 %v1571_v56 }
  0x23   :  { %900 = vmatpush.bf16.msra.mxu0 %v1567_v55  ;;  %913 = vmatpush.bf16.msra.mxu1 %v1571_v56 }
  0x24   :  { %365 = vmatpush.bf16.msrb.mxu2 %v1587_v61 }
  0x25   :  { %378 = vmatpush.bf16.msrb.mxu3 %v1591_v62 }
  0x27   :  { %901 = vmatpush.bf16.msra.mxu0 %v1587_v61  ;;  %914 = vmatpush.bf16.msra.mxu1 %v1591_v62 }
  0x87   :  { %v95_v13 = vpop.f32.mrf.mxu0  ;;  %v139_v14 = vpop.f32.mrf.mxu1 }
  0x88   :  { %v96_v15 = vadd.f32 %v95_v13, %v1499_v11  ;;  %v140_v16 = vadd.f32 %v139_v14, %v1501_v12 }
  0x8a   :  { %v1237_v17 = vmul.f32 -1.442695, %v96_v15  ;;  %176 = vst.msk [vmem:[#allocation2 + $0x8] sm:$0xff] %vm175_vm2, %v140_v16 }
  0x8c   :  { %1342 = vpow2.f32 %v1237_v17 }
  0x8f   :  { %v97_v18 = vpop.f32.mrf.mxu0  ;;  %v141_v19 = vpop.f32.mrf.mxu1 }
  0x90   :  { %v1507_v20 = vadd.f32 %v97_v18, %v1499_v11  ;;  %v142_v21 = vadd.f32 %v141_v19, %v1501_v12 }
  0x91   :  { %v213_v34 = vld [vmem:[#allocation2 + $0x8] sm:$0xff] }
  0x92   :  { %v1343_v22 = vpop.eup %1342  ;;  %178 = vst.msk [vmem:[#allocation2 + $0x18] sm:$0xff] %vm175_vm2, %v142_v21 }
  0x93   :  { %v217_v23 = vadd.f32 1.0, %v1343_v22 }
  0x95   :  { %1344 = vrcp.f32 %v217_v23  ;;  %v229_v27 = vand.u32 2147483648, %v217_v23  ;;  %v227_v29 = vand.u32 2147483647, %v217_v23  ;;  %vm223_vm4 = vweird.f32 %v217_v23 }
  0x97   :  { %v230_v32 = vor.u32 1.1754944e-38, %v229_v27  ;;  %vm228_vm6 = vcmp.eq.f32.partialorder %v227_v29, 8.507059e+37  ;;  %v27_v29 = vld [vmem:[%s1887_s0 + $0x10] sm:$0xff] }
  0x9b   :  { %v1345_v24 = vpop.eup %1344 }
  0x9c   :  { %v219_v25 = vmul.f32 %v1345_v24, %v217_v23  ;;  %vm224_vm3 = vweird.f32 %v1345_v24 }
  0x9d   :  { %vm225_vm5 = vmor %vm223_vm4, %vm224_vm3 }
  0x9e   :  { %v220_v26 = vsub.f32 1.0, %v219_v25 }
  0xa0   :  { %v221_v28 = vmul.f32 %v1345_v24, %v220_v26  ;;  %v243_v26 = vld [vmem:[#allocation2 + $0x18] sm:$0xff] }
  0xa2   :  { %v222_v31 = vadd.f32 %v1345_v24, %v221_v28 }
  0xa4   :  { %v226_v33 = vsel %vm225_vm5, %v1345_v24, %v222_v31  ;;  %v28_v31 = vld [vmem:[%s1887_s0 + $0x18] sm:$0xff] }
  0xa5   :  { %v231_v35 = vsel %vm228_vm6, %v230_v32, %v226_v33  ;;  %v40_v32 = vpack.c.bf16 %v28_v31, %v27_v29 }
  0xa6   :  { %v233_v36 = vmul.f32 %v1514_v30, %v231_v35  ;;  %v236_v63 = vsub.f32 1.0, %v231_v35 }
  0xa7   :  { %1224 = vmatmul.msk.bf16.gmra.mxu0 %vm57_vm1, %v40_v32  ;;  %1231 = vmatmul.msk.bf16.gmra.mxu1 %vm57_vm1, %v40_v32 }
  0xa8   :  { %v234_v37 = vadd.f32 %v233_v36, %v213_v34 }
  0xaa   :  { %1346 = vtanh.f32 %v234_v37 }
  0xb0   :  { %v1347_v38 = vpop.eup %1346 }
  0xb1   :  { %238 = vrot.lane.b32.xlu0 %v1347_v38, %s1453_s27 }
 0x123   :  { %v239_v0 = vpop.permute.xlu0 %238 }
 0x124   :  { %v241_v1 = vmul.f32 %v239_v0, %v236_v63  ;;  %v100_v39 = vpop.f32.mrf.mxu0  ;;  %v144_v45 = vpop.f32.mrf.mxu1 }
 0x125   :  { %v101_v40 = vadd.f32 %v100_v39, %v1499_v11  ;;  %v145_v48 = vadd.f32 %v144_v45, %v1501_v12 }
 0x126   :  { %v244_v2 = vpack.c.bf16 %v241_v1, %v241_v1 }
 0x127   :  { %180 = vst.msk [vmem:[#allocation2 + $0x28] sm:$0xff] %vm175_vm2, %v145_v48 }
 0x128   :  { %246 = vrot.lane.b32.xlu0 %v244_v2, %s1453_s27 }
 0x12c   :  { %v102_v41 = vpop.f32.mrf.mxu0  ;;  %v146_v47 = vpop.f32.mrf.mxu1 }
 0x12d   :  { %v1639_v43 = vadd.f32 %v102_v41, %v1499_v11  ;;  %v147_v51 = vadd.f32 %v146_v47, %v1501_v12 }
 0x12f   :  { %182 = vst.msk [vmem:[#allocation2 + $0x38] sm:$0xff] %vm175_vm2, %v147_v51 }
 0x136   :  { %v417_v47 = vld [vmem:[#allocation2 + $0x38] sm:$0xff] }
 0x19a   :  { %v247_v3 = vpop.permute.xlu0 %246 }
 0x19b   :  { %1270 = vmatmul.msk.bf16.vlgmr.msra.gmra.mxu2 %vm175_vm2, %v247_v3  ;;  %1271 = vmatmul.msk.bf16.vlgmr.msra.gmra.mxu3 %vm175_vm2, %v247_v3 }
 0x19c   :  { %429 = vmatpush.bf16.msra.mxu2 %v1527_v42  ;;  %442 = vmatpush.bf16.msra.mxu3 %v1538_v46 }
 0x1a0   :  { %430 = vmatpush.bf16.msra.mxu2 %v1547_v49  ;;  %443 = vmatpush.bf16.msra.mxu3 %v1551_v50 }
 0x1a4   :  { %431 = vmatpush.bf16.msra.mxu2 %v1567_v55  ;;  %444 = vmatpush.bf16.msra.mxu3 %v1571_v56 }
 0x1a8   :  { %432 = vmatpush.bf16.msra.mxu2 %v1587_v61  ;;  %445 = vmatpush.bf16.msra.mxu3 %v1591_v62 }
 0x21e   :  { %v300_v4 = vpop.f32.mrf.mxu2  ;;  %v313_v5 = vpop.f32.mrf.mxu3 }
 0x21f   :  { %v317_v6 = vadd.f32 %v300_v4, %v1507_v20  ;;  %v337_v20 = vadd.f32 %v1514_v30, %v313_v5 }
 0x221   :  { %v1272_v7 = vmul.f32 -1.442695, %v317_v6 }
 0x223   :  { %1348 = vpow2.f32 %v1272_v7 }
 0x226   :  { %v302_v8 = vpop.f32.mrf.mxu2  ;;  %v315_v9 = vpop.f32.mrf.mxu3 }
 0x229   :  { %v1349_v10 = vpop.eup %1348 }
 0x22a   :  { %v321_v13 = vadd.f32 1.0, %v1349_v10 }
 0x22c   :  { %1350 = vrcp.f32 %v321_v13  ;;  %v333_v17 = vand.u32 2147483648, %v321_v13  ;;  %v331_v19 = vand.u32 2147483647, %v321_v13  ;;  %vm327_vm8 = vweird.f32 %v321_v13 }
 0x22e   :  { %v334_v22 = vor.u32 1.1754944e-38, %v333_v17  ;;  %vm332_vm10 = vcmp.eq.f32.partialorder %v331_v19, 8.507059e+37 }
 0x232   :  { %v1351_v14 = vpop.eup %1350 }
 0x233   :  { %v323_v15 = vmul.f32 %v1351_v14, %v321_v13  ;;  %vm328_vm7 = vweird.f32 %v1351_v14  ;;  %v350_v13 = vld [vmem:[#allocation2 + $0x28] sm:$0xff] }
 0x234   :  { %vm329_vm9 = vmor %vm327_vm8, %vm328_vm7 }
 0x235   :  { %v324_v16 = vsub.f32 1.0, %v323_v15 }
 0x237   :  { %v325_v18 = vmul.f32 %v1351_v14, %v324_v16 }
 0x239   :  { %v326_v21 = vadd.f32 %v1351_v14, %v325_v18 }
 0x23b   :  { %v330_v23 = vsel %vm329_vm9, %v1351_v14, %v326_v21 }
 0x23c   :  { %v335_v24 = vsel %vm332_vm10, %v334_v22, %v330_v23 }
 0x23d   :  { %v338_v25 = vmul.f32 %v337_v20, %v335_v24  ;;  %v341_v33 = vsub.f32 1.0, %v335_v24  ;;  %v347_v35 = vmul.f32 %v335_v24, %v241_v1 }
 0x23f   :  { %v339_v27 = vadd.f32 %v338_v25, %v243_v26 }
 0x241   :  { %1352 = vtanh.f32 %v339_v27 }
 0x247   :  { %v1353_v28 = vpop.eup %1352 }
 0x248   :  { %343 = vrot.lane.b32.xlu1 %v1353_v28, %s1453_s27 }
 0x2ba   :  { %v344_v34 = vpop.permute.xlu1 %343 }
 0x2bb   :  { %v346_v36 = vmul.f32 %v344_v34, %v341_v33 }
 0x2bd   :  { %v348_v37 = vadd.f32 %v347_v35, %v346_v36 }
 0x2bf   :  { %v351_v38 = vpack.c.bf16 %v348_v37, %v348_v37 }
 0x2c1   :  { %353 = vrot.lane.b32.xlu1 %v351_v38, %s1453_s27 }
 0x333   :  { %v354_v44 = vpop.permute.xlu1 %353 }
 0x334   :  { %1273 = vmatmul.msk.bf16.vlgmr.msrb.gmra.mxu2 %vm175_vm2, %v354_v44  ;;  %1274 = vmatmul.msk.bf16.vlgmr.msrb.gmra.mxu3 %vm175_vm2, %v354_v44 }
 0x335   :  { %496 = vmatpush.bf16.msrb.mxu2 %v1527_v42  ;;  %509 = vmatpush.bf16.msrb.mxu3 %v1538_v46 }
 0x339   :  { %497 = vmatpush.bf16.msrb.mxu2 %v1547_v49  ;;  %510 = vmatpush.bf16.msrb.mxu3 %v1551_v50 }
 0x33d   :  { %498 = vmatpush.bf16.msrb.mxu2 %v1567_v55  ;;  %511 = vmatpush.bf16.msrb.mxu3 %v1571_v56 }
 0x341   :  { %499 = vmatpush.bf16.msrb.mxu2 %v1587_v61  ;;  %512 = vmatpush.bf16.msrb.mxu3 %v1591_v62 }
 0x3b7   :  { %v367_v52 = vpop.f32.mrf.mxu2  ;;  %v380_v53 = vpop.f32.mrf.mxu3 }
 0x3b8   :  { %v384_v54 = vadd.f32 %v367_v52, %v101_v40  ;;  %v404_v9 = vadd.f32 %v1514_v30, %v380_v53  ;;  %v29_v52 = vld [vmem:[%s1887_s0 + $0x20] sm:$0xff]  ;;  %v30_v53 = vld [vmem:[%s1887_s0 + $0x28] sm:$0xff] }
 0x3ba   :  { %v1275_v57 = vmul.f32 -1.442695, %v384_v54  ;;  %v41_v54 = vpack.c.bf16 %v30_v53, %v29_v52 }
 0x3bc   :  { %1354 = vpow2.f32 %v1275_v57  ;;  %1225 = vmatmul.msk.bf16.gmra.mxu0 %vm57_vm1, %v41_v54  ;;  %1232 = vmatmul.msk.bf16.gmra.mxu1 %vm57_vm1, %v41_v54 }
 0x3bf   :  { %v369_v58 = vpop.f32.mrf.mxu2  ;;  %v382_v59 = vpop.f32.mrf.mxu3 }
 0x3c2   :  { %v1355_v60 = vpop.eup %1354 }
 0x3c3   :  { %v388_v63 = vadd.f32 1.0, %v1355_v60 }
 0x3c5   :  { %1356 = vrcp.f32 %v388_v63  ;;  %v400_v3 = vand.u32 2147483648, %v388_v63  ;;  %v398_v5 = vand.u32 2147483647, %v388_v63  ;;  %vm394_vm12 = vweird.f32 %v388_v63 }
 0x3c7   :  { %v401_v7 = vor.u32 1.1754944e-38, %v400_v3  ;;  %vm399_vm14 = vcmp.eq.f32.partialorder %v398_v5, 8.507059e+37 }
 0x3cb   :  { %v1357_v0 = vpop.eup %1356 }
 0x3cc   :  { %v390_v1 = vmul.f32 %v1357_v0, %v388_v63  ;;  %vm395_vm11 = vweird.f32 %v1357_v0 }
 0x3cd   :  { %vm396_vm13 = vmor %vm394_vm12, %vm395_vm11 }
 0x3ce   :  { %v391_v2 = vsub.f32 1.0, %v390_v1 }
 0x3d0   :  { %v392_v4 = vmul.f32 %v1357_v0, %v391_v2 }
 0x3d2   :  { %v393_v6 = vadd.f32 %v1357_v0, %v392_v4 }
 0x3d4   :  { %v397_v8 = vsel %vm396_vm13, %v1357_v0, %v393_v6 }
 0x3d5   :  { %v402_v10 = vsel %vm399_vm14, %v401_v7, %v397_v8 }
 0x3d6   :  { %v405_v14 = vmul.f32 %v404_v9, %v402_v10  ;;  %v408_v17 = vsub.f32 1.0, %v402_v10  ;;  %v414_v19 = vmul.f32 %v402_v10, %v348_v37 }
 0x3d8   :  { %v406_v15 = vadd.f32 %v405_v14, %v350_v13 }
 0x3da   :  { %1358 = vtanh.f32 %v406_v15 }
 0x3e0   :  { %v1359_v16 = vpop.eup %1358 }
 0x3e1   :  { %410 = vrot.lane.b32.xlu2 %v1359_v16, %s1453_s27 }
 0x439   :  { %v105_v1 = vpop.f32.mrf.mxu0  ;;  %v149_v6 = vpop.f32.mrf.mxu1 }
 0x43a   :  { %v106_v2 = vadd.f32 %v105_v1, %v1499_v11  ;;  %v150_v8 = vadd.f32 %v149_v6, %v1501_v12 }
 0x43b   :  { %v411_v18 = vpop.permute.xlu2 %410 }
 0x43c   :  { %v413_v21 = vmul.f32 %v411_v18, %v408_v17  ;;  %184 = vst.msk [vmem:[#allocation2 + $0x48] sm:$0xff] %vm175_vm2, %v150_v8 }
 0x43e   :  { %v415_v22 = vadd.f32 %v414_v19, %v413_v21 }
 0x440   :  { %v418_v23 = vpack.c.bf16 %v415_v22, %v415_v22 }
 0x441   :  { %v107_v3 = vpop.f32.mrf.mxu0  ;;  %v151_v7 = vpop.f32.mrf.mxu1 }
 0x442   :  { %420 = vrot.lane.b32.xlu2 %v418_v23, %s1453_s27  ;;  %v1682_v4 = vadd.f32 %v107_v3, %v1499_v11  ;;  %v152_v9 = vadd.f32 %v151_v7, %v1501_v12 }
 0x444   :  { %186 = vst.msk [vmem:[#allocation2 + $0x58] sm:$0xff] %vm175_vm2, %v152_v9 }
 0x44b   :  { %v551_v7 = vld [vmem:[#allocation2 + $0x58] sm:$0xff] }
 0x49c   :  { %v421_v20 = vpop.permute.xlu2 %420 }
 0x49d   :  { %1276 = vmatmul.msk.bf16.vlgmr.msra.gmra.mxu2 %vm175_vm2, %v421_v20  ;;  %1277 = vmatmul.msk.bf16.vlgmr.msra.gmra.mxu3 %vm175_vm2, %v421_v20 }
 0x49e   :  { %563 = vmatpush.bf16.msra.mxu2 %v1527_v42  ;;  %576 = vmatpush.bf16.msra.mxu3 %v1538_v46 }
 0x4a2   :  { %564 = vmatpush.bf16.msra.mxu2 %v1547_v49  ;;  %577 = vmatpush.bf16.msra.mxu3 %v1551_v50 }
 0x4a6   :  { %565 = vmatpush.bf16.msra.mxu2 %v1567_v55  ;;  %578 = vmatpush.bf16.msra.mxu3 %v1571_v56 }
 0x4aa   :  { %566 = vmatpush.bf16.msra.mxu2 %v1587_v61  ;;  %579 = vmatpush.bf16.msra.mxu3 %v1591_v62 }
 0x520   :  { %v434_v24 = vpop.f32.mrf.mxu2  ;;  %v447_v25 = vpop.f32.mrf.mxu3 }
 0x521   :  { %v451_v26 = vadd.f32 %v434_v24, %v1639_v43  ;;  %v471_v43 = vadd.f32 %v1514_v30, %v447_v25 }
 0x523   :  { %v1278_v27 = vmul.f32 -1.442695, %v451_v26 }
 0x525   :  { %1360 = vpow2.f32 %v1278_v27 }
 0x528   :  { %v436_v28 = vpop.f32.mrf.mxu2  ;;  %v449_v29 = vpop.f32.mrf.mxu3 }
 0x52b   :  { %v1361_v31 = vpop.eup %1360 }
 0x52c   :  { %v455_v32 = vadd.f32 1.0, %v1361_v31 }
 0x52e   :  { %1362 = vrcp.f32 %v455_v32  ;;  %v467_v36 = vand.u32 2147483648, %v455_v32  ;;  %v465_v38 = vand.u32 2147483647, %v455_v32  ;;  %vm461_vm0 = vweird.f32 %v455_v32 }
 0x530   :  { %v468_v40 = vor.u32 1.1754944e-38, %v467_v36  ;;  %vm466_vm4 = vcmp.eq.f32.partialorder %v465_v38, 8.507059e+37 }
 0x534   :  { %v1363_v33 = vpop.eup %1362 }
 0x535   :  { %v457_v34 = vmul.f32 %v1363_v33, %v455_v32  ;;  %vm462_vm15 = vweird.f32 %v1363_v33  ;;  %v484_v32 = vld [vmem:[#allocation2 + $0x48] sm:$0xff] }
 0x536   :  { %vm463_vm3 = vmor %vm461_vm0, %vm462_vm15 }
 0x537   :  { %v458_v35 = vsub.f32 1.0, %v457_v34 }
 0x539   :  { %v459_v37 = vmul.f32 %v1363_v33, %v458_v35 }
 0x53b   :  { %v460_v39 = vadd.f32 %v1363_v33, %v459_v37 }
 0x53d   :  { %v464_v41 = vsel %vm463_vm3, %v1363_v33, %v460_v39 }
 0x53e   :  { %v469_v44 = vsel %vm466_vm4, %v468_v40, %v464_v41 }
 0x53f   :  { %v472_v45 = vmul.f32 %v471_v43, %v469_v44  ;;  %v475_v57 = vsub.f32 1.0, %v469_v44  ;;  %v481_v59 = vmul.f32 %v469_v44, %v415_v22 }
 0x541   :  { %v473_v48 = vadd.f32 %v472_v45, %v417_v47 }
 0x543   :  { %1364 = vtanh.f32 %v473_v48 }
 0x549   :  { %v1365_v51 = vpop.eup %1364 }
 0x54a   :  { %477 = vrot.lane.b32.xlu0 %v1365_v51, %s1453_s27 }
 0x5bc   :  { %v478_v58 = vpop.permute.xlu0 %477 }
 0x5bd   :  { %v480_v60 = vmul.f32 %v478_v58, %v475_v57 }
 0x5bf   :  { %v482_v63 = vadd.f32 %v481_v59, %v480_v60 }
 0x5c1   :  { %v485_v0 = vpack.c.bf16 %v482_v63, %v482_v63 }
 0x5c3   :  { %487 = vrot.lane.b32.xlu1 %v485_v0, %s1453_s27 }
 0x635   :  { %v488_v5 = vpop.permute.xlu1 %487 }
 0x636   :  { %1279 = vmatmul.msk.bf16.vlgmr.msrb.gmra.mxu2 %vm175_vm2, %v488_v5  ;;  %1280 = vmatmul.msk.bf16.vlgmr.msrb.gmra.mxu3 %vm175_vm2, %v488_v5 }
 0x637   :  { %630 = vmatpush.bf16.msrb.mxu2 %v1527_v42  ;;  %643 = vmatpush.bf16.msrb.mxu3 %v1538_v46 }
 0x63b   :  { %631 = vmatpush.bf16.msrb.mxu2 %v1547_v49  ;;  %644 = vmatpush.bf16.msrb.mxu3 %v1551_v50 }
 0x63f   :  { %632 = vmatpush.bf16.msrb.mxu2 %v1567_v55  ;;  %645 = vmatpush.bf16.msrb.mxu3 %v1571_v56 }
 0x643   :  { %633 = vmatpush.bf16.msrb.mxu2 %v1587_v61  ;;  %646 = vmatpush.bf16.msrb.mxu3 %v1591_v62 }
 0x6b9   :  { %v501_v10 = vpop.f32.mrf.mxu2  ;;  %v514_v13 = vpop.f32.mrf.mxu3 }
 0x6ba   :  { %v518_v14 = vadd.f32 %v501_v10, %v106_v2  ;;  %v538_v29 = vadd.f32 %v1514_v30, %v514_v13  ;;  %v31_v10 = vld [vmem:[%s1887_s0 + $0x30] sm:$0xff]  ;;  %v32_v13 = vld [vmem:[%s1887_s0 + $0x38] sm:$0xff] }
 0x6bc   :  { %v1281_v15 = vmul.f32 -1.442695, %v518_v14  ;;  %v42_v14 = vpack.c.bf16 %v32_v13, %v31_v10 }
 0x6be   :  { %1366 = vpow2.f32 %v1281_v15  ;;  %1226 = vmatmul.msk.bf16.gmra.mxu0 %vm57_vm1, %v42_v14  ;;  %1233 = vmatmul.msk.bf16.gmra.mxu1 %vm57_vm1, %v42_v14 }
 0x6c1   :  { %v503_v16 = vpop.f32.mrf.mxu2  ;;  %v516_v17 = vpop.f32.mrf.mxu3 }
 0x6c4   :  { %v1367_v18 = vpop.eup %1366 }
 0x6c5   :  { %v522_v19 = vadd.f32 1.0, %v1367_v18 }
 0x6c7   :  { %1368 = vrcp.f32 %v522_v19  ;;  %v534_v20 = vand.u32 2147483648, %v522_v19  ;;  %v532_v25 = vand.u32 2147483647, %v522_v19  ;;  %vm528_vm6 = vweird.f32 %v522_v19 }
 0x6c9   :  { %v535_v27 = vor.u32 1.1754944e-38, %v534_v20  ;;  %vm533_vm8 = vcmp.eq.f32.partialorder %v532_v25, 8.507059e+37 }
 0x6cd   :  { %v1369_v21 = vpop.eup %1368 }
 0x6ce   :  { %v524_v22 = vmul.f32 %v1369_v21, %v522_v19  ;;  %vm529_vm5 = vweird.f32 %v1369_v21 }
 0x6cf   :  { %vm530_vm7 = vmor %vm528_vm6, %vm529_vm5 }
 0x6d0   :  { %v525_v23 = vsub.f32 1.0, %v524_v22 }
 0x6d2   :  { %v526_v24 = vmul.f32 %v1369_v21, %v525_v23 }
 0x6d4   :  { %v527_v26 = vadd.f32 %v1369_v21, %v526_v24 }
 0x6d6   :  { %v531_v28 = vsel %vm530_vm7, %v1369_v21, %v527_v26 }
 0x6d7   :  { %v536_v31 = vsel %vm533_vm8, %v535_v27, %v531_v28 }
 0x6d8   :  { %v539_v33 = vmul.f32 %v538_v29, %v536_v31  ;;  %v542_v36 = vsub.f32 1.0, %v536_v31  ;;  %v548_v38 = vmul.f32 %v536_v31, %v482_v63 }
 0x6da   :  { %v540_v34 = vadd.f32 %v539_v33, %v484_v32 }
 0x6dc   :  { %1370 = vtanh.f32 %v540_v34 }
 0x6e2   :  { %v1371_v35 = vpop.eup %1370 }
 0x6e3   :  { %544 = vrot.lane.b32.xlu2 %v1371_v35, %s1453_s27 }
 0x73b   :  { %v110_v23 = vpop.f32.mrf.mxu0  ;;  %v154_v26 = vpop.f32.mrf.mxu1 }
 0x73c   :  { %v111_v20 = vadd.f32 %v110_v23, %v1499_v11  ;;  %v155_v28 = vadd.f32 %v154_v26, %v1501_v12 }
 0x73d   :  { %v545_v37 = vpop.permute.xlu2 %544 }
 0x73e   :  { %v547_v39 = vmul.f32 %v545_v37, %v542_v36  ;;  %188 = vst.msk [vmem:[#allocation2 + $0x68] sm:$0xff] %vm175_vm2, %v155_v28 }
 0x740   :  { %v549_v40 = vadd.f32 %v548_v38, %v547_v39 }
 0x742   :  { %v552_v41 = vpack.c.bf16 %v549_v40, %v549_v40 }
 0x743   :  { %v112_v24 = vpop.f32.mrf.mxu0  ;;  %v156_v27 = vpop.f32.mrf.mxu1 }
 0x744   :  { %554 = vrot.lane.b32.xlu0 %v552_v41, %s1453_s27  ;;  %v113_v25 = vadd.f32 %v112_v24, %v1499_v11  ;;  %v157_v29 = vadd.f32 %v156_v27, %v1501_v12 }
 0x746   :  { %190 = vst.msk [vmem:[#allocation2 + $0x78] sm:$0xff] %vm175_vm2, %v157_v29 }
 0x74d   :  { %v685_v27 = vld [vmem:[#allocation2 + $0x78] sm:$0xff] }
 0x7b6   :  { %v555_v43 = vpop.permute.xlu0 %554 }
 0x7b7   :  { %1282 = vmatmul.msk.bf16.vlgmr.msra.gmra.mxu2 %vm175_vm2, %v555_v43  ;;  %1283 = vmatmul.msk.bf16.vlgmr.msra.gmra.mxu3 %vm175_vm2, %v555_v43 }
 0x7b8   :  { %697 = vmatpush.bf16.msra.mxu2 %v1527_v42  ;;  %710 = vmatpush.bf16.msra.mxu3 %v1538_v46 }
 0x7bc   :  { %698 = vmatpush.bf16.msra.mxu2 %v1547_v49  ;;  %711 = vmatpush.bf16.msra.mxu3 %v1551_v50 }
 0x7c0   :  { %699 = vmatpush.bf16.msra.mxu2 %v1567_v55  ;;  %712 = vmatpush.bf16.msra.mxu3 %v1571_v56 }
 0x7c4   :  { %700 = vmatpush.bf16.msra.mxu2 %v1587_v61  ;;  %713 = vmatpush.bf16.msra.mxu3 %v1591_v62 }
 0x83a   :  { %v568_v44 = vpop.f32.mrf.mxu2  ;;  %v581_v45 = vpop.f32.mrf.mxu3 }
 0x83b   :  { %v585_v47 = vadd.f32 %v568_v44, %v1682_v4  ;;  %v605_v4 = vadd.f32 %v1514_v30, %v581_v45 }
 0x83d   :  { %v1284_v48 = vmul.f32 -1.442695, %v585_v47 }
 0x83f   :  { %1372 = vpow2.f32 %v1284_v48 }
 0x842   :  { %v570_v51 = vpop.f32.mrf.mxu2  ;;  %v583_v52 = vpop.f32.mrf.mxu3 }
 0x845   :  { %v1373_v53 = vpop.eup %1372 }
 0x846   :  { %v589_v54 = vadd.f32 1.0, %v1373_v53 }
 0x848   :  { %1374 = vrcp.f32 %v589_v54  ;;  %v601_v60 = vand.u32 2147483648, %v589_v54  ;;  %v599_v0 = vand.u32 2147483647, %v589_v54  ;;  %vm595_vm10 = vweird.f32 %v589_v54 }
 0x84a   :  { %v602_v2 = vor.u32 1.1754944e-38, %v601_v60  ;;  %vm600_vm12 = vcmp.eq.f32.partialorder %v599_v0, 8.507059e+37 }
 0x84e   :  { %v1375_v57 = vpop.eup %1374 }
 0x84f   :  { %v591_v58 = vmul.f32 %v1375_v57, %v589_v54  ;;  %vm596_vm9 = vweird.f32 %v1375_v57  ;;  %v618_v54 = vld [vmem:[#allocation2 + $0x68] sm:$0xff] }
 0x850   :  { %vm597_vm11 = vmor %vm595_vm10, %vm596_vm9 }
 0x851   :  { %v592_v59 = vsub.f32 1.0, %v591_v58 }
 0x853   :  { %v593_v63 = vmul.f32 %v1375_v57, %v592_v59 }
 0x855   :  { %v594_v1 = vadd.f32 %v1375_v57, %v593_v63 }
 0x857   :  { %v598_v3 = vsel %vm597_vm11, %v1375_v57, %v594_v1 }
 0x858   :  { %v603_v5 = vsel %vm600_vm12, %v602_v2, %v598_v3 }
 0x859   :  { %v606_v6 = vmul.f32 %v605_v4, %v603_v5  ;;  %v609_v15 = vsub.f32 1.0, %v603_v5  ;;  %v615_v17 = vmul.f32 %v603_v5, %v549_v40 }
 0x85b   :  { %v607_v8 = vadd.f32 %v606_v6, %v551_v7 }
 0x85d   :  { %1376 = vtanh.f32 %v607_v8 }
 0x863   :  { %v1377_v9 = vpop.eup %1376 }
 0x864   :  { %611 = vrot.lane.b32.xlu1 %v1377_v9, %s1453_s27 }
 0x8d6   :  { %v612_v16 = vpop.permute.xlu1 %611 }
 0x8d7   :  { %v614_v18 = vmul.f32 %v612_v16, %v609_v15 }
 0x8d9   :  { %v616_v19 = vadd.f32 %v615_v17, %v614_v18 }
 0x8db   :  { %v619_v21 = vpack.c.bf16 %v616_v19, %v616_v19 }
 0x8dd   :  { %621 = vrot.lane.b32.xlu2 %v619_v21, %s1453_s27 }
 0x937   :  { %v622_v22 = vpop.permute.xlu2 %621 }
 0x938   :  { %1285 = vmatmul.msk.bf16.vlgmr.msrb.gmra.mxu2 %vm175_vm2, %v622_v22  ;;  %1286 = vmatmul.msk.bf16.vlgmr.msrb.gmra.mxu3 %vm175_vm2, %v622_v22 }
 0x939   :  { %831 = vmatpush.bf16.msrb.mxu2 %v1527_v42  ;;  %844 = vmatpush.bf16.msrb.mxu3 %v1538_v46 }
 0x93d   :  { %832 = vmatpush.bf16.msrb.mxu2 %v1547_v49  ;;  %845 = vmatpush.bf16.msrb.mxu3 %v1551_v50 }
 0x941   :  { %833 = vmatpush.bf16.msrb.mxu2 %v1567_v55  ;;  %846 = vmatpush.bf16.msrb.mxu3 %v1571_v56 }
 0x945   :  { %834 = vmatpush.bf16.msrb.mxu2 %v1587_v61  ;;  %847 = vmatpush.bf16.msrb.mxu3 %v1591_v62 }
 0x9bb   :  { %v635_v31 = vpop.f32.mrf.mxu2  ;;  %v648_v32 = vpop.f32.mrf.mxu3 }
 0x9bc   :  { %v652_v33 = vadd.f32 %v635_v31, %v111_v20  ;;  %v672_v52 = vadd.f32 %v1514_v30, %v648_v32  ;;  %v33_v31 = vld [vmem:[%s1887_s0 + $0x40] sm:$0xff]  ;;  %v34_v32 = vld [vmem:[%s1887_s0 + $0x48] sm:$0xff] }
 0x9be   :  { %v1287_v34 = vmul.f32 -1.442695, %v652_v33  ;;  %v43_v33 = vpack.c.bf16 %v34_v32, %v33_v31  ;;  %v1824_v32 = vld [vmem:[%s1891_s4 + $0x1] ss:$0 sm:$0xff] }
 0x9c0   :  { %1378 = vpow2.f32 %v1287_v34  ;;  %1227 = vmatmul.msk.bf16.gmra.mxu0 %vm57_vm1, %v43_v33  ;;  %1234 = vmatmul.msk.bf16.gmra.mxu1 %vm57_vm1, %v43_v33  ;;  %v36_v34 = vld [vmem:[%s1887_s0 + $0x58] sm:$0xff] }
 0x9c3   :  { %v637_v35 = vpop.f32.mrf.mxu2  ;;  %v650_v36 = vpop.f32.mrf.mxu3 }
 0x9c6   :  { %v1379_v37 = vpop.eup %1378 }
 0x9c7   :  { %v656_v38 = vadd.f32 1.0, %v1379_v37 }
 0x9c9   :  { %1380 = vrcp.f32 %v656_v38  ;;  %v668_v43 = vand.u32 2147483648, %v656_v38  ;;  %v666_v45 = vand.u32 2147483647, %v656_v38  ;;  %vm662_vm14 = vweird.f32 %v656_v38 }
 0x9cb   :  { %v669_v48 = vor.u32 1.1754944e-38, %v668_v43  ;;  %vm667_vm0 = vcmp.eq.f32.partialorder %v666_v45, 8.507059e+37  ;;  %v38_v43 = vld [vmem:[%s1887_s0 + $0x68] sm:$0xff] }
 0x9cf   :  { %v1381_v39 = vpop.eup %1380 }
 0x9d0   :  { %v658_v40 = vmul.f32 %v1381_v39, %v656_v38  ;;  %vm663_vm13 = vweird.f32 %v1381_v39 }
 0x9d1   :  { %vm664_vm15 = vmor %vm662_vm14, %vm663_vm13 }
 0x9d2   :  { %v659_v41 = vsub.f32 1.0, %v658_v40 }
 0x9d4   :  { %v660_v44 = vmul.f32 %v1381_v39, %v659_v41  ;;  %v37_v41 = vld [vmem:[%s1887_s0 + $0x60] sm:$0xff] }
 0x9d5   :  { %v45_v45 = vpack.c.bf16 %v38_v43, %v37_v41 }
 0x9d6   :  { %v661_v47 = vadd.f32 %v1381_v39, %v660_v44 }
 0x9d8   :  { %v665_v51 = vsel %vm664_vm15, %v1381_v39, %v661_v47 }
 0x9d9   :  { %v670_v53 = vsel %vm667_vm0, %v669_v48, %v665_v51 }
 0x9da   :  { %v673_v57 = vmul.f32 %v672_v52, %v670_v53  ;;  %v676_v60 = vsub.f32 1.0, %v670_v53  ;;  %v682_v0 = vmul.f32 %v670_v53, %v616_v19 }
 0x9dc   :  { %v674_v58 = vadd.f32 %v673_v57, %v618_v54 }
 0x9de   :  { %1382 = vtanh.f32 %v674_v58 }
 0x9e4   :  { %v1383_v59 = vpop.eup %1382 }
 0x9e5   :  { %678 = vrot.lane.b32.xlu0 %v1383_v59, %s1453_s27 }
 0xa3d   :  { %v115_v47 = vpop.f32.mrf.mxu0  ;;  %v159_v48 = vpop.f32.mrf.mxu1 }
 0xa3e   :  { %v116_v51 = vadd.f32 %v115_v47, %v1499_v11  ;;  %v160_v52 = vadd.f32 %v159_v48, %v1501_v12 }
 0xa40   :  { %192 = vst.msk [vmem:[#allocation2 + $0x88] sm:$0xff] %vm175_vm2, %v160_v52 }
 0xa45   :  { %v117_v53 = vpop.f32.mrf.mxu0  ;;  %v161_v54 = vpop.f32.mrf.mxu1 }
 0xa46   :  { %v1787_v57 = vadd.f32 %v117_v53, %v1499_v11  ;;  %v162_v58 = vadd.f32 %v161_v54, %v1501_v12 }
 0xa48   :  { %194 = vst.msk [vmem:[#allocation2 + $0x98] sm:$0xff] %vm175_vm2, %v162_v58 }
 0xa57   :  { %v679_v63 = vpop.permute.xlu0 %678 }
 0xa58   :  { %v681_v1 = vmul.f32 %v679_v63, %v676_v60 }
 0xa5a   :  { %v683_v2 = vadd.f32 %v682_v0, %v681_v1 }
 0xa5c   :  { %v686_v3 = vpack.c.bf16 %v683_v2, %v683_v2 }
 0xa5e   :  { %688 = vrot.lane.b32.xlu1 %v686_v3, %s1453_s27 }
 0xad0   :  { %v689_v4 = vpop.permute.xlu1 %688 }
 0xad1   :  { %1288 = vmatmul.msk.bf16.vlgmr.msra.gmra.mxu2 %vm175_vm2, %v689_v4  ;;  %1289 = vmatmul.msk.bf16.vlgmr.msra.gmra.mxu3 %vm175_vm2, %v689_v4 }
 0xad2   :  { %965 = vmatpush.bf16.msra.mxu2 %v1527_v42  ;;  %978 = vmatpush.bf16.msra.mxu3 %v1538_v46 }
 0xad6   :  { %966 = vmatpush.bf16.msra.mxu2 %v1547_v49  ;;  %979 = vmatpush.bf16.msra.mxu3 %v1551_v50 }
 0xada   :  { %967 = vmatpush.bf16.msra.mxu2 %v1567_v55  ;;  %980 = vmatpush.bf16.msra.mxu3 %v1571_v56 }
 0xade   :  { %968 = vmatpush.bf16.msra.mxu2 %v1587_v61  ;;  %981 = vmatpush.bf16.msra.mxu3 %v1591_v62 }
 0xb54   :  { %v702_v5 = vpop.f32.mrf.mxu2  ;;  %v715_v6 = vpop.f32.mrf.mxu3 }
 0xb55   :  { %v719_v7 = vadd.f32 %v702_v5, %v113_v25  ;;  %v739_v24 = vadd.f32 %v1514_v30, %v715_v6  ;;  %v35_v30 = vld [vmem:[%s1887_s0 + $0x50] sm:$0xff] }
 0xb56   :  { %v44_v35 = vpack.c.bf16 %v36_v34, %v35_v30 }
 0xb57   :  { %v1290_v8 = vmul.f32 -1.442695, %v719_v7 }
 0xb58   :  { %1228 = vmatmul.msk.bf16.gmra.mxu0 %vm57_vm1, %v44_v35  ;;  %1235 = vmatmul.msk.bf16.gmra.mxu1 %vm57_vm1, %v44_v35  ;;  %v752_v35 = vld [vmem:[#allocation2 + $0x88] sm:$0xff] }
 0xb59   :  { %1384 = vpow2.f32 %v1290_v8 }
 0xb5c   :  { %v704_v9 = vpop.f32.mrf.mxu2  ;;  %v717_v10 = vpop.f32.mrf.mxu3 }
 0xb5f   :  { %v1385_v13 = vpop.eup %1384 }
 0xb60   :  { %v723_v14 = vadd.f32 1.0, %v1385_v13 }
 0xb62   :  { %1386 = vrcp.f32 %v723_v14  ;;  %v735_v18 = vand.u32 2147483648, %v723_v14  ;;  %v733_v21 = vand.u32 2147483647, %v723_v14  ;;  %vm729_vm4 = vweird.f32 %v723_v14 }
 0xb64   :  { %v736_v23 = vor.u32 1.1754944e-38, %v735_v18  ;;  %vm734_vm6 = vcmp.eq.f32.partialorder %v733_v21, 8.507059e+37 }
 0xb68   :  { %v1387_v15 = vpop.eup %1386  ;;  %1229 = vmatmul.msk.bf16.gmra.mxu0 %vm57_vm1, %v45_v45  ;;  %1236 = vmatmul.msk.bf16.gmra.mxu1 %vm57_vm1, %v45_v45 }
 0xb69   :  { %v725_v16 = vmul.f32 %v1387_v15, %v723_v14  ;;  %vm730_vm3 = vweird.f32 %v1387_v15 }
 0xb6a   :  { %vm731_vm5 = vmor %vm729_vm4, %vm730_vm3 }
 0xb6b   :  { %v726_v17 = vsub.f32 1.0, %v725_v16 }
 0xb6d   :  { %v727_v19 = vmul.f32 %v1387_v15, %v726_v17 }
 0xb6f   :  { %v728_v22 = vadd.f32 %v1387_v15, %v727_v19 }
 0xb71   :  { %v732_v20 = vsel %vm731_vm5, %v1387_v15, %v728_v22 }
 0xb72   :  { %v737_v25 = vsel %vm734_vm6, %v736_v23, %v732_v20 }
 0xb73   :  { %v740_v26 = vmul.f32 %v739_v24, %v737_v25  ;;  %v743_v36 = vsub.f32 1.0, %v737_v25  ;;  %v749_v38 = vmul.f32 %v737_v25, %v683_v2 }
 0xb75   :  { %v741_v28 = vadd.f32 %v740_v26, %v685_v27 }
 0xb77   :  { %1388 = vtanh.f32 %v741_v28 }
 0xb7d   :  { %v1389_v29 = vpop.eup %1388 }
 0xb7e   :  { %745 = vrot.lane.b32.xlu2 %v1389_v29, %s1453_s27 }
 0xbd5   :  { %v120_v59 = vpop.f32.mrf.mxu0  ;;  %v164_v60 = vpop.f32.mrf.mxu1 }
 0xbd6   :  { %v1792_v63 = vadd.f32 %v120_v59, %v1499_v11  ;;  %v165_v0 = vadd.f32 %v164_v60, %v1501_v12 }
 0xbd8   :  { %v746_v37 = vpop.permute.xlu2 %745  ;;  %196 = vst.msk [vmem:[#allocation2 + $0xa8] sm:$0xff] %vm175_vm2, %v165_v0 }
 0xbd9   :  { %v748_v39 = vmul.f32 %v746_v37, %v743_v36 }
 0xbdb   :  { %v1770_v40 = vadd.f32 %v749_v38, %v748_v39 }
 0xbdd   :  { %v753_v44 = vpack.c.bf16 %v1770_v40, %v1770_v40  ;;  %v122_v2 = vpop.f32.mrf.mxu0  ;;  %v166_v3 = vpop.f32.mrf.mxu1 }
 0xbde   :  { %v1803_v4 = vadd.f32 %v122_v2, %v1499_v11  ;;  %v167_v5 = vadd.f32 %v166_v3, %v1501_v12  ;;  %v819_v2 = vld [vmem:[#allocation2 + $0x98] sm:$0xff] }
 0xbdf   :  { %755 = vrot.lane.b32.xlu0 %v753_v44, %s1453_s27 }
 0xbe0   :  { %198 = vst.msk [vmem:[#allocation2 + $0xb8] sm:$0xff] %vm175_vm2, %v167_v5 }
 0xbe5   :  { %v125_v6 = vpop.f32.mrf.mxu0  ;;  %v169_v7 = vpop.f32.mrf.mxu1 }
 0xbe6   :  { %v1812_v8 = vadd.f32 %v125_v6, %v1499_v11  ;;  %v170_v9 = vadd.f32 %v169_v7, %v1501_v12 }
 0xbe8   :  { %200 = vst.msk [vmem:[#allocation2 + $0xc8] sm:$0xff] %vm175_vm2, %v170_v9 }
 0xbed   :  { %v127_v10 = vpop.f32.mrf.mxu0  ;;  %v171_v13 = vpop.f32.mrf.mxu1 }
 0xbee   :  { %v1817_v14 = vadd.f32 %v127_v10, %v1499_v11  ;;  %v172_v15 = vadd.f32 %v171_v13, %v1501_v12 }
 0xbf0   :  { %202 = vst.msk [vmem:[#allocation2 + $0xd8] sm:$0xff] %vm175_vm2, %v172_v15 }
 0xc51   :  { %v756_v1 = vpop.permute.xlu0 %755 }
 0xc52   :  { %1291 = vmatmul.msk.bf16.vlgmr.msrb.gmra.mxu0 %vm175_vm2, %v756_v1  ;;  %1292 = vmatmul.msk.bf16.vlgmr.msrb.gmra.mxu1 %vm175_vm2, %v756_v1 }
 0xc53   :  { %1032 = vmatpush.bf16.msrb.mxu0 %v1527_v42  ;;  %1045 = vmatpush.bf16.msrb.mxu1 %v1538_v46 }
 0xc57   :  { %1033 = vmatpush.bf16.msrb.mxu0 %v1547_v49  ;;  %1046 = vmatpush.bf16.msrb.mxu1 %v1551_v50 }
 0xc5b   :  { %1034 = vmatpush.bf16.msrb.mxu0 %v1567_v55  ;;  %1047 = vmatpush.bf16.msrb.mxu1 %v1571_v56 }
 0xc5f   :  { %1035 = vmatpush.bf16.msrb.mxu0 %v1587_v61  ;;  %1048 = vmatpush.bf16.msrb.mxu1 %v1591_v62 }
 0xccf   :  { %v769_v16 = vpop.f32.mrf.mxu0  ;;  %v782_v17 = vpop.f32.mrf.mxu1 }
 0xcd0   :  { %v786_v18 = vadd.f32 %v769_v16, %v116_v51  ;;  %v806_v33 = vadd.f32 %v1824_v32, %v782_v17 }
 0xcd2   :  { %v1293_v19 = vmul.f32 -1.442695, %v786_v18 }
 0xcd4   :  { %1390 = vpow2.f32 %v1293_v19 }
 0xcd7   :  { %v771_v21 = vpop.f32.mrf.mxu0  ;;  %v784_v22 = vpop.f32.mrf.mxu1 }
 0xcda   :  { %v1391_v23 = vpop.eup %1390 }
 0xcdb   :  { %v790_v20 = vadd.f32 1.0, %v1391_v23 }
 0xcdd   :  { %1392 = vrcp.f32 %v790_v20  ;;  %v802_v27 = vand.u32 2147483648, %v790_v20  ;;  %v800_v28 = vand.u32 2147483647, %v790_v20  ;;  %vm796_vm7 = vweird.f32 %v790_v20 }
 0xcdf   :  { %v803_v29 = vor.u32 1.1754944e-38, %v802_v27  ;;  %vm801_vm9 = vcmp.eq.f32.partialorder %v800_v28, 8.507059e+37 }
 0xce3   :  { %v1393_v24 = vpop.eup %1392 }
 0xce4   :  { %v792_v25 = vmul.f32 %v1393_v24, %v790_v20  ;;  %vm797_vm1 = vweird.f32 %v1393_v24 }
 0xce5   :  { %vm798_vm8 = vmor %vm796_vm7, %vm797_vm1 }
 0xce6   :  { %v793_v26 = vsub.f32 1.0, %v792_v25 }
 0xce8   :  { %v794_v11 = vmul.f32 %v1393_v24, %v793_v26 }
 0xcea   :  { %v795_v12 = vadd.f32 %v1393_v24, %v794_v11 }
 0xcec   :  { %v799_v31 = vsel %vm798_vm8, %v1393_v24, %v795_v12 }
 0xced   :  { %v804_v30 = vsel %vm801_vm9, %v803_v29, %v799_v31 }
 0xcee   :  { %v807_v34 = vmul.f32 %v806_v33, %v804_v30  ;;  %v810_v38 = vsub.f32 1.0, %v804_v30  ;;  %v816_v41 = vmul.f32 %v804_v30, %v1770_v40 }
 0xcf0   :  { %v808_v36 = vadd.f32 %v807_v34, %v752_v35  ;;  %v886_v35 = vld [vmem:[#allocation2 + $0xa8] sm:$0xff] }
 0xcf2   :  { %1394 = vtanh.f32 %v808_v36 }
 0xcf8   :  { %v1395_v37 = vpop.eup %1394 }
 0xcf9   :  { %812 = vrot.lane.b32.xlu1 %v1395_v37, %s1453_s27 }
 0xd6b   :  { %v813_v39 = vpop.permute.xlu1 %812 }
 0xd6c   :  { %v815_v43 = vmul.f32 %v813_v39, %v810_v38 }
 0xd6e   :  { %v817_v44 = vadd.f32 %v816_v41, %v815_v43 }
 0xd70   :  { %v820_v45 = vpack.c.bf16 %v817_v44, %v817_v44 }
 0xd72   :  { %822 = vrot.lane.b32.xlu2 %v820_v45, %s1453_s27 }
 0xdcc   :  { %v823_v47 = vpop.permute.xlu2 %822 }
 0xdcd   :  { %1294 = vmatmul.msk.bf16.vlgmr.msrb.gmra.mxu2 %vm175_vm2, %v823_v47  ;;  %1295 = vmatmul.msk.bf16.vlgmr.msrb.gmra.mxu3 %vm175_vm2, %v823_v47 }
 0xdce   :  { %1099 = vmatpush.bf16.msrb.mxu2 %v1527_v42  ;;  %1112 = vmatpush.bf16.msrb.mxu3 %v1538_v46 }
 0xdd2   :  { %1100 = vmatpush.bf16.msrb.mxu2 %v1547_v49  ;;  %1113 = vmatpush.bf16.msrb.mxu3 %v1551_v50 }
 0xdd6   :  { %1101 = vmatpush.bf16.msrb.mxu2 %v1567_v55  ;;  %1114 = vmatpush.bf16.msrb.mxu3 %v1571_v56 }
 0xdda   :  { %1102 = vmatpush.bf16.msrb.mxu2 %v1587_v61  ;;  %1115 = vmatpush.bf16.msrb.mxu3 %v1591_v62 }
 0xe50   :  { %v836_v40 = vpop.f32.mrf.mxu2  ;;  %v849_v48 = vpop.f32.mrf.mxu3 }
 0xe51   :  { %v853_v51 = vadd.f32 %v836_v40, %v1787_v57  ;;  %v873_v57 = vadd.f32 %v1824_v32, %v849_v48 }
 0xe53   :  { %v1296_v52 = vmul.f32 -1.442695, %v853_v51 }
 0xe55   :  { %1396 = vpow2.f32 %v1296_v52 }
 0xe58   :  { %v838_v42 = vpop.f32.mrf.mxu2  ;;  %v851_v46 = vpop.f32.mrf.mxu3 }
 0xe5b   :  { %v1397_v53 = vpop.eup %1396 }
 0xe5c   :  { %v857_v49 = vadd.f32 1.0, %v1397_v53 }
 0xe5e   :  { %1398 = vrcp.f32 %v857_v49  ;;  %v869_v58 = vand.u32 2147483648, %v857_v49  ;;  %v867_v61 = vand.u32 2147483647, %v857_v49  ;;  %vm863_vm11 = vweird.f32 %v857_v49 }
 0xe60   :  { %v870_v62 = vor.u32 1.1754944e-38, %v869_v58  ;;  %vm868_vm13 = vcmp.eq.f32.partialorder %v867_v61, 8.507059e+37 }
 0xe64   :  { %v1399_v50 = vpop.eup %1398 }
 0xe65   :  { %v859_v54 = vmul.f32 %v1399_v50, %v857_v49  ;;  %vm864_vm10 = vweird.f32 %v1399_v50 }
 0xe66   :  { %vm865_vm12 = vmor %vm863_vm11, %vm864_vm10 }
 0xe67   :  { %v860_v55 = vsub.f32 1.0, %v859_v54 }
 0xe69   :  { %v861_v56 = vmul.f32 %v1399_v50, %v860_v55 }
 0xe6b   :  { %v862_v59 = vadd.f32 %v1399_v50, %v861_v56 }
 0xe6d   :  { %v866_v60 = vsel %vm865_vm12, %v1399_v50, %v862_v59 }
 0xe6e   :  { %v871_v0 = vsel %vm868_vm13, %v870_v62, %v866_v60 }
 0xe6f   :  { %v874_v1 = vmul.f32 %v873_v57, %v871_v0  ;;  %v877_v6 = vsub.f32 1.0, %v871_v0  ;;  %v883_v9 = vmul.f32 %v871_v0, %v817_v44 }
 0xe71   :  { %v875_v3 = vadd.f32 %v874_v1, %v819_v2  ;;  %v953_v1 = vld [vmem:[#allocation2 + $0xb8] sm:$0xff] }
 0xe73   :  { %1400 = vtanh.f32 %v875_v3 }
 0xe79   :  { %v1401_v5 = vpop.eup %1400 }
 0xe7a   :  { %879 = vrot.lane.b32.xlu0 %v1401_v5, %s1453_s27 }
 0xeec   :  { %v880_v7 = vpop.permute.xlu0 %879 }
 0xeed   :  { %v882_v10 = vmul.f32 %v880_v7, %v877_v6 }
 0xeef   :  { %v884_v13 = vadd.f32 %v883_v9, %v882_v10 }
 0xef1   :  { %v887_v15 = vpack.c.bf16 %v884_v13, %v884_v13 }
 0xef3   :  { %889 = vrot.lane.b32.xlu1 %v887_v15, %s1453_s27 }
 0xf65   :  { %v890_v16 = vpop.permute.xlu1 %889 }
 0xf66   :  { %1297 = vmatmul.msk.bf16.vlgmr.msra.gmra.mxu0 %vm175_vm2, %v890_v16  ;;  %1298 = vmatmul.msk.bf16.vlgmr.msra.gmra.mxu1 %vm175_vm2, %v890_v16 }
 0xfe3   :  { %v903_v17 = vpop.f32.mrf.mxu0  ;;  %v916_v18 = vpop.f32.mrf.mxu1 }
 0xfe4   :  { %v920_v19 = vadd.f32 %v903_v17, %v1792_v63  ;;  %v940_v63 = vadd.f32 %v1824_v32, %v916_v18 }
 0xfe6   :  { %v1299_v21 = vmul.f32 -1.442695, %v920_v19 }
 0xfe8   :  { %1402 = vpow2.f32 %v1299_v21 }
 0xfeb   :  { %v905_v22 = vpop.f32.mrf.mxu0  ;;  %v918_v23 = vpop.f32.mrf.mxu1 }
 0xfee   :  { %v1403_v20 = vpop.eup %1402 }
 0xfef   :  { %v924_v24 = vadd.f32 1.0, %v1403_v20 }
 0xff1   :  { %1404 = vrcp.f32 %v924_v24  ;;  %v936_v11 = vand.u32 2147483648, %v924_v24  ;;  %v934_v12 = vand.u32 2147483647, %v924_v24  ;;  %vm930_vm15 = vweird.f32 %v924_v24 }
 0xff3   :  { %v937_v31 = vor.u32 1.1754944e-38, %v936_v11  ;;  %vm935_vm3 = vcmp.eq.f32.partialorder %v934_v12, 8.507059e+37 }
 0xff7   :  { %v1405_v25 = vpop.eup %1404 }
 0xff8   :  { %v926_v26 = vmul.f32 %v1405_v25, %v924_v24  ;;  %vm931_vm14 = vweird.f32 %v1405_v25 }
 0xff9   :  { %vm932_vm0 = vmor %vm930_vm15, %vm931_vm14 }
 0xffa   :  { %v927_v27 = vsub.f32 1.0, %v926_v26 }
 0xffc   :  { %v928_v28 = vmul.f32 %v1405_v25, %v927_v27 }
 0xffe   :  { %v929_v29 = vadd.f32 %v1405_v25, %v928_v28 }
0x1000   :  { %v933_v33 = vsel %vm932_vm0, %v1405_v25, %v929_v29 }
0x1001   :  { %v938_v30 = vsel %vm935_vm3, %v937_v31, %v933_v33 }
0x1002   :  { %v941_v34 = vmul.f32 %v940_v63, %v938_v30  ;;  %v944_v38 = vsub.f32 1.0, %v938_v30  ;;  %v950_v41 = vmul.f32 %v938_v30, %v884_v13  ;;  %v1020_v30 = vld [vmem:[#allocation2 + $0xc8] sm:$0xff] }
0x1004   :  { %v942_v36 = vadd.f32 %v941_v34, %v886_v35 }
0x1006   :  { %1406 = vtanh.f32 %v942_v36 }
0x100c   :  { %v1407_v37 = vpop.eup %1406 }
0x100d   :  { %946 = vrot.lane.b32.xlu2 %v1407_v37, %s1453_s27 }
0x1067   :  { %v947_v39 = vpop.permute.xlu2 %946 }
0x1068   :  { %v949_v43 = vmul.f32 %v947_v39, %v944_v38 }
0x106a   :  { %v951_v44 = vadd.f32 %v950_v41, %v949_v43 }
0x106c   :  { %v954_v45 = vpack.c.bf16 %v951_v44, %v951_v44 }
0x106e   :  { %956 = vrot.lane.b32.xlu0 %v954_v45, %s1453_s27 }
0x10e0   :  { %v957_v47 = vpop.permute.xlu0 %956 }
0x10e1   :  { %1300 = vmatmul.msk.bf16.vlgmr.msra.gmra.mxu2 %vm175_vm2, %v957_v47  ;;  %1301 = vmatmul.msk.bf16.vlgmr.msra.gmra.mxu3 %vm175_vm2, %v957_v47 }
0x1164   :  { %v970_v40 = vpop.f32.mrf.mxu2  ;;  %v983_v48 = vpop.f32.mrf.mxu3 }
0x1165   :  { %v987_v51 = vadd.f32 %v970_v40, %v1803_v4  ;;  %v1007_v4 = vadd.f32 %v1824_v32, %v983_v48 }
0x1167   :  { %v1302_v52 = vmul.f32 -1.442695, %v987_v51 }
0x1169   :  { %1408 = vpow2.f32 %v1302_v52 }
0x116c   :  { %v972_v42 = vpop.f32.mrf.mxu2  ;;  %v985_v46 = vpop.f32.mrf.mxu3 }
0x116f   :  { %v1409_v53 = vpop.eup %1408 }
0x1170   :  { %v991_v49 = vadd.f32 1.0, %v1409_v53 }
0x1172   :  { %1410 = vrcp.f32 %v991_v49  ;;  %v1003_v58 = vand.u32 2147483648, %v991_v49  ;;  %v1001_v61 = vand.u32 2147483647, %v991_v49  ;;  %vm997_vm5 = vweird.f32 %v991_v49 }
0x1174   :  { %v1004_v62 = vor.u32 1.1754944e-38, %v1003_v58  ;;  %vm1002_vm1 = vcmp.eq.f32.partialorder %v1001_v61, 8.507059e+37 }
0x1178   :  { %v1411_v50 = vpop.eup %1410 }
0x1179   :  { %v993_v54 = vmul.f32 %v1411_v50, %v991_v49  ;;  %vm998_vm4 = vweird.f32 %v1411_v50 }
0x117a   :  { %vm999_vm6 = vmor %vm997_vm5, %vm998_vm4 }
0x117b   :  { %v994_v55 = vsub.f32 1.0, %v993_v54 }
0x117d   :  { %v995_v56 = vmul.f32 %v1411_v50, %v994_v55 }
0x117f   :  { %v996_v59 = vadd.f32 %v1411_v50, %v995_v56 }
0x1181   :  { %v1000_v60 = vsel %vm999_vm6, %v1411_v50, %v996_v59 }
0x1182   :  { %v1005_v57 = vsel %vm1002_vm1, %v1004_v62, %v1000_v60 }
0x1183   :  { %v1008_v0 = vmul.f32 %v1007_v4, %v1005_v57  ;;  %v1011_v5 = vsub.f32 1.0, %v1005_v57  ;;  %v1017_v7 = vmul.f32 %v1005_v57, %v951_v44  ;;  %v1087_v4 = vld [vmem:[#allocation2 + $0xd8] sm:$0xff] }
0x1185   :  { %v1009_v2 = vadd.f32 %v1008_v0, %v953_v1  ;;  %v1337_v1 = vld [vmem:[%s1890_s3 + $0x18] sm:$0xff] }
0x1186   :  { %1197 = vmatpush.bf16.msra.mxu0 %v1337_v1 }
0x1187   :  { %1412 = vtanh.f32 %v1009_v2  ;;  %v1336_v2 = vld [vmem:[%s1890_s3 + $0x10] sm:$0xff] }
0x118a   :  { %1198 = vmatpush.bf16.msra.mxu0 %v1336_v2 }
0x118d   :  { %v1413_v3 = vpop.eup %1412 }
0x118e   :  { %1013 = vrot.lane.b32.xlu1 %v1413_v3, %s1453_s27  ;;  %v1334_v3 = vld [vmem:[%s1890_s3] sm:$0xff] }
0x1200   :  { %v1014_v6 = vpop.permute.xlu1 %1013 }
0x1201   :  { %v1016_v9 = vmul.f32 %v1014_v6, %v1011_v5 }
0x1203   :  { %v1018_v10 = vadd.f32 %v1017_v7, %v1016_v9 }
0x1205   :  { %v1021_v13 = vpack.c.bf16 %v1018_v10, %v1018_v10 }
0x1207   :  { %1023 = vrot.lane.b32.xlu2 %v1021_v13, %s1453_s27 }
0x1261   :  { %v1024_v15 = vpop.permute.xlu2 %1023 }
0x1262   :  { %1303 = vmatmul.msk.bf16.vlgmr.msrb.gmra.mxu0 %vm175_vm2, %v1024_v15  ;;  %1304 = vmatmul.msk.bf16.vlgmr.msrb.gmra.mxu1 %vm175_vm2, %v1024_v15 }
0x12df   :  { %v1037_v16 = vpop.f32.mrf.mxu0  ;;  %v1050_v17 = vpop.f32.mrf.mxu1 }
0x12e0   :  { %v1054_v18 = vadd.f32 %v1037_v16, %v1812_v8  ;;  %v1074_v8 = vadd.f32 %v1824_v32, %v1050_v17  ;;  %v1341_v16 = vld [vmem:[%s1891_s4 + $0x2] ss:$0 sm:$0xff] }
0x12e2   :  { %v1305_v19 = vmul.f32 -1.442695, %v1054_v18 }
0x12e4   :  { %1414 = vpow2.f32 %v1305_v19 }
0x12e7   :  { %v1039_v21 = vpop.f32.mrf.mxu0  ;;  %v1052_v22 = vpop.f32.mrf.mxu1 }
0x12ea   :  { %v1415_v23 = vpop.eup %1414 }
0x12eb   :  { %v1058_v20 = vadd.f32 1.0, %v1415_v23 }
0x12ed   :  { %1416 = vrcp.f32 %v1058_v20  ;;  %v1070_v27 = vand.u32 2147483648, %v1058_v20  ;;  %v1068_v28 = vand.u32 2147483647, %v1058_v20  ;;  %vm1064_vm8 = vweird.f32 %v1058_v20 }
0x12ef   :  { %v1071_v29 = vor.u32 1.1754944e-38, %v1070_v27  ;;  %vm1069_vm10 = vcmp.eq.f32.partialorder %v1068_v28, 8.507059e+37 }
0x12f3   :  { %v1417_v24 = vpop.eup %1416 }
0x12f4   :  { %v1060_v25 = vmul.f32 %v1417_v24, %v1058_v20  ;;  %vm1065_vm7 = vweird.f32 %v1417_v24 }
0x12f5   :  { %vm1066_vm9 = vmor %vm1064_vm8, %vm1065_vm7 }
0x12f6   :  { %v1061_v26 = vsub.f32 1.0, %v1060_v25 }
0x12f8   :  { %v1062_v11 = vmul.f32 %v1417_v24, %v1061_v26 }
0x12fa   :  { %v1063_v12 = vadd.f32 %v1417_v24, %v1062_v11 }
0x12fc   :  { %v1067_v31 = vsel %vm1066_vm9, %v1417_v24, %v1063_v12 }
0x12fd   :  { %v1072_v33 = vsel %vm1069_vm10, %v1071_v29, %v1067_v31 }
0x12fe   :  { %v1075_v63 = vmul.f32 %v1074_v8, %v1072_v33  ;;  %v1078_v36 = vsub.f32 1.0, %v1072_v33  ;;  %v1084_v38 = vmul.f32 %v1072_v33, %v1018_v10 }
0x1300   :  { %v1076_v34 = vadd.f32 %v1075_v63, %v1020_v30 }
0x1302   :  { %1418 = vtanh.f32 %v1076_v34 }
0x1308   :  { %v1419_v35 = vpop.eup %1418 }
0x1309   :  { %1080 = vrot.lane.b32.xlu0 %v1419_v35, %s1453_s27 }
0x137b   :  { %v1081_v37 = vpop.permute.xlu0 %1080 }
0x137c   :  { %v1083_v39 = vmul.f32 %v1081_v37, %v1078_v36 }
0x137e   :  { %v1085_v41 = vadd.f32 %v1084_v38, %v1083_v39 }
0x1380   :  { %v1088_v43 = vpack.c.bf16 %v1085_v41, %v1085_v41 }
0x1382   :  { %1090 = vrot.lane.b32.xlu1 %v1088_v43, %s1453_s27 }
0x13f4   :  { %v1091_v44 = vpop.permute.xlu1 %1090 }
0x13f5   :  { %1306 = vmatmul.msk.bf16.vlgmr.msrb.gmra.mxu2 %vm175_vm2, %v1091_v44  ;;  %1307 = vmatmul.msk.bf16.vlgmr.msrb.gmra.mxu3 %vm175_vm2, %v1091_v44 }
0x1478   :  { %v1104_v45 = vpop.f32.mrf.mxu2  ;;  %v1117_v47 = vpop.f32.mrf.mxu3 }
0x1479   :  { %v1121_v40 = vadd.f32 %v1104_v45, %v1817_v14  ;;  %v1141_v14 = vadd.f32 %v1824_v32, %v1117_v47  ;;  %v1335_v32 = vld [vmem:[%s1890_s3 + $0x8] sm:$0xff] }
0x147a   :  { %1199 = vmatpush.bf16.msra.mxu0 %v1335_v32 }
0x147b   :  { %v1308_v48 = vmul.f32 -1.442695, %v1121_v40 }
0x147d   :  { %1420 = vpow2.f32 %v1308_v48 }
0x147e   :  { %1200 = vmatpush.bf16.msra.mxu0 %v1334_v3 }
0x1480   :  { %v1106_v51 = vpop.f32.mrf.mxu2  ;;  %v1119_v52 = vpop.f32.mrf.mxu3 }
0x1483   :  { %v1421_v42 = vpop.eup %1420 }
0x1484   :  { %v1125_v46 = vadd.f32 1.0, %v1421_v42 }
0x1486   :  { %1422 = vrcp.f32 %v1125_v46  ;;  %v1137_v54 = vand.u32 2147483648, %v1125_v46  ;;  %v1135_v58 = vand.u32 2147483647, %v1125_v46  ;;  %vm1131_vm12 = vweird.f32 %v1125_v46 }
0x1488   :  { %v1138_v61 = vor.u32 1.1754944e-38, %v1137_v54  ;;  %vm1136_vm14 = vcmp.eq.f32.partialorder %v1135_v58, 8.507059e+37 }
0x148c   :  { %v1423_v53 = vpop.eup %1422 }
0x148d   :  { %v1127_v49 = vmul.f32 %v1423_v53, %v1125_v46  ;;  %vm1132_vm11 = vweird.f32 %v1423_v53 }
0x148e   :  { %vm1133_vm13 = vmor %vm1131_vm12, %vm1132_vm11 }
0x148f   :  { %v1128_v50 = vsub.f32 1.0, %v1127_v49 }
0x1491   :  { %v1129_v55 = vmul.f32 %v1423_v53, %v1128_v50 }
0x1493   :  { %v1130_v56 = vadd.f32 %v1423_v53, %v1129_v55 }
0x1495   :  { %v1134_v59 = vsel %vm1133_vm13, %v1423_v53, %v1130_v56 }
0x1496   :  { %v1139_v62 = vsel %vm1136_vm14, %v1138_v61, %v1134_v59 }
0x1497   :  { %v1142_v60 = vmul.f32 %v1141_v14, %v1139_v62  ;;  %v1145_v5 = vsub.f32 1.0, %v1139_v62  ;;  %v1151_v7 = vmul.f32 %v1139_v62, %v1085_v41 }
0x1499   :  { %v1143_v57 = vadd.f32 %v1142_v60, %v1087_v4 }
0x149b   :  { %1424 = vtanh.f32 %v1143_v57 }
0x14a1   :  { %v1425_v0 = vpop.eup %1424 }
0x14a2   :  { %1147 = vrot.lane.b32.xlu2 %v1425_v0, %s1453_s27 }
0x14fc   :  { %v1148_v6 = vpop.permute.xlu2 %1147 }
0x14fd   :  { %v1150_v9 = vmul.f32 %v1148_v6, %v1145_v5 }
0x14ff   :  { %v1152_v10 = vadd.f32 %v1151_v7, %v1150_v9 }
0x1501   :  { %v1153_v13 = vpack.c.bf16 %v1152_v10, %v1152_v10 }
0x1503   :  { %1164 = vrot.lane.b32.xlu0 %v1153_v13, %s1453_s27 }
0x1575   :  { %v1165_v15 = vpop.permute.xlu0 %1164 }
0x1576   :  { %1325 = vmatmul.msk.bf16.vlgmr.msra.gmra.mxu0 %vm175_vm2, %v1165_v15 }
0x15f3   :  { %v1202_v17 = vpop.f32.mrf.mxu0 }
0x15f4   :  { %v1203_v18 = vadd.f32 %v1341_v16, %v1202_v17 }
0x15f6   :  { %1206 = vst [vmem:[#allocation3] sm:$0xff] %v1203_v18 }
0x15f7   :  { %1217 = dma.vmem_to_hbm [thread:$0]  %s1213_s19, 128, %s1215_s21, [#allocation4]  }
0x15fb   :  { %v1204_v19 = vpop.f32.mrf.mxu0 }
0x15fc   :  { %1451 = dma.done.wait [#allocation4], 128  }
0x15fd   :  { %1452 = vsyncadd [#allocation4], 4294967168 }
0x15fe   :  { %1222 = vsyncpa [#allocation4], 1 }

</bundles_post_ra>
